<compile_context>
chip_gen: v6e
topology: v6e:2x2x1
jax: 0.10.0
libtpu: 0.0.40
codegen_flags: <defaults>
</compile_context>

<pallas_src>
import math
import numpy as np
import jax
import jax.numpy as jnp
from jax import lax
from jax.experimental import pallas as pl
from jax.experimental.pallas import tpu as pltpu


def _round_up(n, m):
    return (n + m - 1) // m * m


def _default_vmem_limit():
    """Generation-aware VMEM limit: ~96 MiB on 128-MiB chips, 48 MiB on v7x."""
    try:
        cap = pltpu.get_tpu_info().vmem_capacity_bytes
    except Exception:
        cap = 64 * 1024 * 1024
    if cap >= 100 * 1024 * 1024:
        return 96 * 1024 * 1024
    return 48 * 1024 * 1024


def _make_kernel(TM, T, Cp, width, pad, halo_left, pair_taps):
    """Kernel for one (TM, T, Cp) tile of rows."""
    base = halo_left - pad                 # scratch index of logical xpad[0]
    extra = 1 if pair_taps else 0          # phantom tap row (zero weights)
    npairs = (width + 1) // 2

    def kernel(x_ref, w1_ref, w2_ref, bn_ref, out_ref, pad_ref):
        cdt = pad_ref.dtype
        # Zero only the time halos (== PyTorch zero padding).  The interior is
        # fully overwritten below; zeroing every step keeps this correct when
        # the "parallel" grid axis is core-split.
        if halo_left > 0:
            pad_ref[:, :halo_left, :] = jnp.zeros((TM, halo_left, Cp), cdt)
        if pad + extra > 0:
            pad_ref[:, halo_left + T:, :] = jnp.zeros((TM, pad + extra, Cp), cdt)

        x = x_ref[...]                                  # (TM, T, Cp) bf16
        pad_ref[:, halo_left:halo_left + T, :] = x      # aligned interior store

        s1 = bn_ref[0:1, :]                             # folded BN1 scale (1, Cp)
        t1 = bn_ref[1:2, :]                             # folded BN1 shift
        s2 = bn_ref[2:3, :]
        t2 = bn_ref[3:4, :]

        def conv(w_ref):
            # Batched matmuls over the whole row tile, f32 accumulation.
            acc = jnp.zeros((TM * T, Cp), jnp.float32)
            if pair_taps:
                # Two taps per matmul -> K = 2*Cp fills the 256-deep MXU.
                for p in range(npairs):                 # static unroll
                    s = base + 2 * p
                    a = jnp.concatenate(
                        [pad_ref[:, s:s + T, :], pad_ref[:, s + 1:s + 1 + T, :]],
                        axis=-1).reshape(TM * T, 2 * Cp)
                    acc = acc + jnp.dot(a, w_ref[p],
                                        preferred_element_type=jnp.float32)
            else:
                for k in range(width):                  # static unroll
                    a = pad_ref[:, base + k:base + k + T, :].reshape(TM * T, Cp)
                    acc = acc + jnp.dot(a, w_ref[k],
                                        preferred_element_type=jnp.float32)
            return acc

        # ---- conv1 -> bn1 -> relu (f32 epilogue) --------------------------
        h = jnp.maximum(conv(w1_ref) * s1 + t1, 0.0)
        # reuse the same padded scratch as conv2's padded input
        pad_ref[:, halo_left:halo_left + T, :] = h.astype(cdt).reshape(TM, T, Cp)

        # ---- conv2 -> bn2 -> +residual -> relu ----------------------------
        res = x.astype(jnp.float32).reshape(TM * T, Cp)
        o = jnp.maximum(conv(w2_ref) * s2 + t2 + res, 0.0)
        out_ref[...] = o.reshape(TM, T, Cp).astype(out_ref.dtype)

    return kernel


def speech_basic_block(x, w1, w2, bn1, bn2, width, *,
                       compute_dtype=jnp.bfloat16,
                       out_dtype=jnp.float32,
                       pair_taps=True,          # set False on v5e (128-deep MXU)
                       max_rows_per_tile=None,
                       vmem_limit_bytes=None):
    """x: (N, C, H, T) float32 (PyTorch NCHW).
    w1: (width, Cin, planes), w2: (width, planes, planes)
      (from PyTorch (Cout, Cin, 1, width): w_jax = w_torch[:, :, 0, :].transpose(2, 1, 0))
    bn1/bn2: (gamma, beta, running_mean, running_var).
    Returns (N, planes, H, T) in out_dtype."""
    N, Cin, H, T = x.shape
    wd, w_cin, planes = w1.shape
    assert wd == width and w_cin == Cin
    assert w2.shape == (width, planes, planes)
    assert planes == Cin, "downsample=None requires planes == inplanes"
    assert width % 2 == 1, "only odd conv widths supported (default width=9)"
    pad = (width - 1) // 2
    Cp = _round_up(planes, 128)                 # lane-dense channel axis
    M = N * H

    cbytes = jnp.dtype(compute_dtype).itemsize
    halo_left = _round_up(pad, 16)              # sublane-aligned interior stores
    extra = 1 if pair_taps else 0
    Tscr = halo_left + T + pad + extra
    npairs = (width + 1) // 2

    # ---- consistent VMEM accounting -> row-tile size ----------------------
    vmem_limit = _default_vmem_limit() if vmem_limit_bytes is None else vmem_limit_bytes
    budget = int(vmem_limit * 0.85)             # headroom for compiler scratch
    n_taps = npairs if pair_taps else width
    n_wrows = 2 * Cp if pair_taps else Cp
    fixed = 2 * n_taps * n_wrows * Cp * cbytes + 4 * Cp * 4   # resident weights + BN
    per_row = (2 * T * Cp * cbytes      # x block (double-buffered, bf16)
               + 2 * T * Cp * cbytes    # out block (double-buffered, bf16)
               + Tscr * Cp * cbytes     # padded scratch (shared by both convs)
               + 4 * T * Cp * 4         # live f32 temporaries (acc/h/res/o)
               + 2 * T * Cp * cbytes)   # paired-tap concat temporary
    TM = max(int(max(budget - fixed, per_row) // per_row), 1)
    if max_rows_per_tile is not None:
        TM = min(TM, max_rows_per_tile)
    # Keep >= 4 grid steps so v7x's 2 TensorCores each see >= 2 pipelined steps.
    TM = min(TM, max(1, -(-M // 4)))
    TM = min(TM, M)
    grid_m = pl.cdiv(M, TM)
    Mp = grid_m * TM

    # ---- layout: NCHW -> (rows, time, channels); pad rows + channels ------
    x_rows = jnp.transpose(x, (0, 2, 3, 1)).reshape(M, T, Cin)
    xp = jnp.pad(x_rows.astype(compute_dtype),
                 ((0, Mp - M), (0, 0), (0, Cp - Cin)))

    if pair_taps:
        def pack_w(w, cin, cout):
            wp = jnp.zeros((npairs, 2 * Cp, Cp), compute_dtype)
            wp = wp.at[:, :cin, :cout].set(w[0::2].astype(compute_dtype))
            if width > 1:
                wp = wp.at[:width // 2, Cp:Cp + cin, :cout].set(
                    w[1::2].astype(compute_dtype))
            return wp
    else:
        def pack_w(w, cin, cout):
            wp = jnp.zeros((width, Cp, Cp), compute_dtype)
            return wp.at[:, :cin, :cout].set(w.astype(compute_dtype))

    w1p = pack_w(w1, Cin, planes)
    w2p = pack_w(w2, planes, planes)

    eps = 1e-5

    def fold(p):
        g, b, m, v = p
        s = g / jnp.sqrt(v + eps)
        return s, b - m * s

    s1, t1 = fold(bn1)
    s2, t2 = fold(bn2)
    bn_packed = jnp.zeros((4, Cp), jnp.float32)
    bn_packed = bn_packed.at[0, :planes].set(s1).at[1, :planes].set(t1)
    bn_packed = bn_packed.at[2, :planes].set(s2).at[3, :planes].set(t2)

    # Advisory cost estimate so XLA can overlap the surrounding layout ops.
    flops = 2 * 2 * (2 * npairs if pair_taps else width) * Mp * T * Cp * Cp
    bytes_accessed = (Mp * T * Cp * cbytes * 2          # x in + out
                      + int(w1p.size) * cbytes + int(w2p.size) * cbytes
                      + int(bn_packed.size) * 4)

    kernel = _make_kernel(TM, T, Cp, width, pad, halo_left, pair_taps)
    resident = pl.BlockSpec(memory_space=pltpu.MemorySpace.VMEM)  # single-buffered
    out_rows = pl.pallas_call(
        kernel,
        out_shape=jax.ShapeDtypeStruct((Mp, T, Cp), compute_dtype),
        grid_spec=pltpu.PrefetchScalarGridSpec(
            num_scalar_prefetch=0,
            grid=(grid_m,),
            in_specs=[
                pl.BlockSpec((TM, T, Cp), lambda i: (i, 0, 0)),   # x tile
                resident,                                         # w1 (VMEM resident)
                resident,                                         # w2 (VMEM resident)
                resident,                                         # folded BN
            ],
            out_specs=pl.BlockSpec((TM, T, Cp), lambda i: (i, 0, 0)),
            scratch_shapes=[pltpu.VMEM((TM, Tscr, Cp), compute_dtype)],
        ),
        compiler_params=pltpu.CompilerParams(
            dimension_semantics=("parallel",),
            vmem_limit_bytes=vmem_limit,
        ),
        cost_estimate=pl.CostEstimate(flops=int(flops), transcendentals=0,
                                      bytes_accessed=int(bytes_accessed)),
    )(xp, w1p, w2p, bn_packed)

    out = out_rows[:M, :, :planes].reshape(N, H, T, planes)
    return jnp.transpose(out, (0, 3, 1, 2)).astype(out_dtype)


def _ref_forward(x, w1, w2, bn1, bn2, width, matmul_dtype=None):
    """Pure-JAX reference mirroring the PyTorch module (inference-mode BN).
    If matmul_dtype is set, conv inputs (activations + weights) are rounded to
    that dtype with f32 accumulation, matching the kernel's MXU precision."""
    pad = (width - 1) // 2
    eps = 1e-5

    def conv(inp, w):
        if matmul_dtype is not None:
            inp = inp.astype(matmul_dtype).astype(jnp.float32)
            w = w.astype(matmul_dtype).astype(jnp.float32)
        cout, cin = w.shape[2], w.shape[1]
        w_oihw = jnp.transpose(w, (2, 1, 0)).reshape(cout, cin, 1, width)
        return lax.conv_general_dilated(
            inp, w_oihw, window_strides=(1, 1),
            padding=((0, 0), (pad, pad)),
            dimension_numbers=("NCHW", "OIHW", "NCHW"),
            precision=lax.Precision.HIGHEST)

    def bn(y, p):
        g, b, m, v = p
        return ((y - m[None, :, None, None])
                / jnp.sqrt(v + eps)[None, :, None, None]
                * g[None, :, None, None] + b[None, :, None, None])

    residual = x
    if matmul_dtype is not None:
        residual = x.astype(matmul_dtype).astype(jnp.float32)
    h = jnp.maximum(bn(conv(x, w1), bn1), 0.0)
    out = bn(conv(h, w2), bn2)
    return jnp.maximum(out + residual, 0.0)


if __name__ == "__main__":
    # Small shapes consistent with the module: speech features (N, C, H, T).
    N, Cin, H, T = 2, 16, 3, 32
    planes, width = 16, 9          # inplanes == planes (downsample=None)

    key = jax.random.PRNGKey(0)
    ks = jax.random.split(key, 11)
    x = jax.random.normal(ks[0], (N, Cin, H, T), jnp.float32)
    w1 = jax.random.normal(ks[1], (width, Cin, planes), jnp.float32) / math.sqrt(Cin * width)
    w2 = jax.random.normal(ks[2], (width, planes, planes), jnp.float32) / math.sqrt(planes * width)
    bn1 = (1.0 + 0.1 * jax.random.normal(ks[3], (planes,), jnp.float32),   # gamma
           0.1 * jax.random.normal(ks[4], (planes,), jnp.float32),          # beta
           0.1 * jax.random.normal(ks[5], (planes,), jnp.float32),          # running_mean
           0.5 + jax.random.uniform(ks[6], (planes,), jnp.float32))         # running_var
    bn2 = (1.0 + 0.1 * jax.random.normal(ks[7], (planes,), jnp.float32),
           0.1 * jax.random.normal(ks[8], (planes,), jnp.float32),
           0.1 * jax.random.normal(ks[9], (planes,), jnp.float32),
           0.5 + jax.random.uniform(ks[10], (planes,), jnp.float32))

    # M = N*H = 6 rows; the >=4-grid-step cap forces a multi-step pipelined
    # grid even at these tiny shapes.
    out = jax.block_until_ready(
        speech_basic_block(x, w1, w2, bn1, bn2, width))
    assert out.shape == (N, planes, H, T)

    # 1) tight check vs a reference that mirrors the kernel's bf16 matmul
    #    inputs + f32 accumulation (kernel additionally rounds the output to
    #    bf16, hence 2e-2).
    ref_bf16 = jax.block_until_ready(
        _ref_forward(x, w1, w2, bn1, bn2, width, matmul_dtype=jnp.bfloat16))
    if not np.allclose(np.asarray(out), np.asarray(ref_bf16), rtol=2e-2, atol=2e-2):
        raise AssertionError("Pallas kernel mismatch vs bf16-matmul reference")

    # 2) loose check vs the full-f32 PyTorch-equivalent reference (difference
    #    is only bf16 rounding of matmul inputs / residual / output).
    ref_f32 = jax.block_until_ready(_ref_forward(x, w1, w2, bn1, bn2, width))
    if not np.allclose(np.asarray(out), np.asarray(ref_f32), rtol=5e-2, atol=5e-2):
        raise AssertionError("Pallas kernel mismatch vs f32 reference")

    print("KERNEL_OK")
</pallas_src>

<mosaic_0001>
module attributes {stable_mosaic.version = 11 : i64} {
  func.func @kernel(%arg0: i32, %arg1: memref<2x32x128xbf16, #tpu.memory_space<vmem>>, %arg2: memref<5x256x128xbf16, #tpu.memory_space<vmem>>, %arg3: memref<5x256x128xbf16, #tpu.memory_space<vmem>>, %arg4: memref<4x128xf32, #tpu.memory_space<vmem>>, %arg5: memref<2x32x128xbf16, #tpu.memory_space<vmem>>, %arg6: memref<2x53x128xbf16, #tpu.memory_space<vmem>>) attributes {dimension_semantics = [#tpu.dimension_semantics<parallel>], iteration_bounds = array<i64: 3>, scalar_prefetch = 0 : i64, scratch_operands = 1 : i64, tpu.core_type = #tpu.core_type<tc>, window_params = [{transform_indices = @transform_0, window_bounds = array<i64: 2, 32, 128>}, {pipeline_mode = #tpu.pipeline_mode<synchronous>, transform_indices = @transform_1, window_bounds = array<i64: 5, 256, 128>}, {pipeline_mode = #tpu.pipeline_mode<synchronous>, transform_indices = @transform_2, window_bounds = array<i64: 5, 256, 128>}, {pipeline_mode = #tpu.pipeline_mode<synchronous>, transform_indices = @transform_3, window_bounds = array<i64: 4, 128>}, {transform_indices = @transform_4, window_bounds = array<i64: 2, 32, 128>}]} {
    %cst = arith.constant 0.000000e+00 : bf16
    %0 = vector.broadcast %cst : bf16 to vector<2x16x128xbf16>
    %c0 = arith.constant 0 : index
    %c0_0 = arith.constant 0 : index
    %c0_1 = arith.constant 0 : index
    %1 = vector.load %arg6[%c0, %c0_0, %c0_1] : memref<2x53x128xbf16, #tpu.memory_space<vmem>>, vector<2x16x128xbf16>
    tpu.vector_store %arg6[%c0, %c0_0, %c0_1], %0 {strides = array<i32>} : memref<2x53x128xbf16, #tpu.memory_space<vmem>>, vector<2x16x128xbf16>,
    %cst_2 = arith.constant 0.000000e+00 : bf16
    %2 = vector.broadcast %cst_2 : bf16 to vector<2x5x128xbf16>
    %c0_3 = arith.constant 0 : index
    %c48 = arith.constant 48 : index
    %c0_4 = arith.constant 0 : index
    %3 = vector.load %arg6[%c0_3, %c48, %c0_4] : memref<2x53x128xbf16, #tpu.memory_space<vmem>>, vector<2x5x128xbf16>
    tpu.vector_store %arg6[%c0_3, %c48, %c0_4], %2 {strides = array<i32>} : memref<2x53x128xbf16, #tpu.memory_space<vmem>>, vector<2x5x128xbf16>,
    %c0_5 = arith.constant 0 : index
    %c0_6 = arith.constant 0 : index
    %c0_7 = arith.constant 0 : index
    %4 = vector.load %arg1[%c0_5, %c0_6, %c0_7] : memref<2x32x128xbf16, #tpu.memory_space<vmem>>, vector<2x32x128xbf16>
    %c0_8 = arith.constant 0 : index
    %c16 = arith.constant 16 : index
    %c0_9 = arith.constant 0 : index
    %5 = vector.load %arg6[%c0_8, %c16, %c0_9] : memref<2x53x128xbf16, #tpu.memory_space<vmem>>, vector<2x32x128xbf16>
    tpu.vector_store %arg6[%c0_8, %c16, %c0_9], %4 {strides = array<i32>} : memref<2x53x128xbf16, #tpu.memory_space<vmem>>, vector<2x32x128xbf16>,
    %c0_10 = arith.constant 0 : index
    %c0_11 = arith.constant 0 : index
    %6 = vector.load %arg4[%c0_10, %c0_11] : memref<4x128xf32, #tpu.memory_space<vmem>>, vector<1x128xf32>
    %c1 = arith.constant 1 : index
    %c0_12 = arith.constant 0 : index
    %7 = vector.load %arg4[%c1, %c0_12] : memref<4x128xf32, #tpu.memory_space<vmem>>, vector<1x128xf32>
    %c2 = arith.constant 2 : index
    %c0_13 = arith.constant 0 : index
    %8 = vector.load %arg4[%c2, %c0_13] : memref<4x128xf32, #tpu.memory_space<vmem>>, vector<1x128xf32>
    %c3 = arith.constant 3 : index
    %c0_14 = arith.constant 0 : index
    %9 = vector.load %arg4[%c3, %c0_14] : memref<4x128xf32, #tpu.memory_space<vmem>>, vector<1x128xf32>
    %cst_15 = arith.constant 0.000000e+00 : f32
    %10 = vector.broadcast %cst_15 : f32 to vector<64x128xf32>
    %c0_16 = arith.constant 0 : index
    %c12 = arith.constant 12 : index
    %c0_17 = arith.constant 0 : index
    %11 = vector.load %arg6[%c0_16, %c12, %c0_17] : memref<2x53x128xbf16, #tpu.memory_space<vmem>>, vector<2x32x128xbf16>
    %c0_18 = arith.constant 0 : index
    %c13 = arith.constant 13 : index
    %c0_19 = arith.constant 0 : index
    %12 = vector.load %arg6[%c0_18, %c13, %c0_19] : memref<2x53x128xbf16, #tpu.memory_space<vmem>>, vector<2x32x128xbf16>
    %13 = tpu.concatenate %11, %12 in 2 : vector<2x32x128xbf16>, vector<2x32x128xbf16> -> vector<2x32x256xbf16>
    %14 = vector.shape_cast %13 : vector<2x32x256xbf16> to vector<64x256xbf16>
    %c0_20 = arith.constant 0 : index
    %c0_21 = arith.constant 0 : index
    %c0_22 = arith.constant 0 : index
    %15 = vector.load %arg2[%c0_20, %c0_21, %c0_22] : memref<5x256x128xbf16, #tpu.memory_space<vmem>>, vector<1x256x128xbf16>
    %16 = vector.shape_cast %15 : vector<1x256x128xbf16> to vector<256x128xbf16>
    %cst_23 = arith.constant dense<0.000000e+00> : vector<64x128xf32>
    %17 = tpu.matmul %14, %16, %cst_23 {dimension_numbers = #tpu.dot_dimension_numbers<[1], [0], [0], [1], [0, 0, 1, 1], [], []>} : vector<64x256xbf16>, vector<256x128xbf16>, vector<64x128xf32> -> vector<64x128xf32>
    %18 = arith.addf %10, %17 : vector<64x128xf32>
    %c0_24 = arith.constant 0 : index
    %c14 = arith.constant 14 : index
    %c0_25 = arith.constant 0 : index
    %19 = vector.load %arg6[%c0_24, %c14, %c0_25] : memref<2x53x128xbf16, #tpu.memory_space<vmem>>, vector<2x32x128xbf16>
    %c0_26 = arith.constant 0 : index
    %c15 = arith.constant 15 : index
    %c0_27 = arith.constant 0 : index
    %20 = vector.load %arg6[%c0_26, %c15, %c0_27] : memref<2x53x128xbf16, #tpu.memory_space<vmem>>, vector<2x32x128xbf16>
    %21 = tpu.concatenate %19, %20 in 2 : vector<2x32x128xbf16>, vector<2x32x128xbf16> -> vector<2x32x256xbf16>
    %22 = vector.shape_cast %21 : vector<2x32x256xbf16> to vector<64x256xbf16>
    %c1_28 = arith.constant 1 : index
    %c0_29 = arith.constant 0 : index
    %c0_30 = arith.constant 0 : index
    %23 = vector.load %arg2[%c1_28, %c0_29, %c0_30] : memref<5x256x128xbf16, #tpu.memory_space<vmem>>, vector<1x256x128xbf16>
    %24 = vector.shape_cast %23 : vector<1x256x128xbf16> to vector<256x128xbf16>
    %cst_31 = arith.constant dense<0.000000e+00> : vector<64x128xf32>
    %25 = tpu.matmul %22, %24, %cst_31 {dimension_numbers = #tpu.dot_dimension_numbers<[1], [0], [0], [1], [0, 0, 1, 1], [], []>} : vector<64x256xbf16>, vector<256x128xbf16>, vector<64x128xf32> -> vector<64x128xf32>
    %26 = arith.addf %18, %25 : vector<64x128xf32>
    %c0_32 = arith.constant 0 : index
    %c16_33 = arith.constant 16 : index
    %c0_34 = arith.constant 0 : index
    %27 = vector.load %arg6[%c0_32, %c16_33, %c0_34] : memref<2x53x128xbf16, #tpu.memory_space<vmem>>, vector<2x32x128xbf16>
    %c0_35 = arith.constant 0 : index
    %c17 = arith.constant 17 : index
    %c0_36 = arith.constant 0 : index
    %28 = vector.load %arg6[%c0_35, %c17, %c0_36] : memref<2x53x128xbf16, #tpu.memory_space<vmem>>, vector<2x32x128xbf16>
    %29 = tpu.concatenate %27, %28 in 2 : vector<2x32x128xbf16>, vector<2x32x128xbf16> -> vector<2x32x256xbf16>
    %30 = vector.shape_cast %29 : vector<2x32x256xbf16> to vector<64x256xbf16>
    %c2_37 = arith.constant 2 : index
    %c0_38 = arith.constant 0 : index
    %c0_39 = arith.constant 0 : index
    %31 = vector.load %arg2[%c2_37, %c0_38, %c0_39] : memref<5x256x128xbf16, #tpu.memory_space<vmem>>, vector<1x256x128xbf16>
    %32 = vector.shape_cast %31 : vector<1x256x128xbf16> to vector<256x128xbf16>
    %cst_40 = arith.constant dense<0.000000e+00> : vector<64x128xf32>
    %33 = tpu.matmul %30, %32, %cst_40 {dimension_numbers = #tpu.dot_dimension_numbers<[1], [0], [0], [1], [0, 0, 1, 1], [], []>} : vector<64x256xbf16>, vector<256x128xbf16>, vector<64x128xf32> -> vector<64x128xf32>
    %34 = arith.addf %26, %33 : vector<64x128xf32>
    %c0_41 = arith.constant 0 : index
    %c18 = arith.constant 18 : index
    %c0_42 = arith.constant 0 : index
    %35 = vector.load %arg6[%c0_41, %c18, %c0_42] : memref<2x53x128xbf16, #tpu.memory_space<vmem>>, vector<2x32x128xbf16>
    %c0_43 = arith.constant 0 : index
    %c19 = arith.constant 19 : index
    %c0_44 = arith.constant 0 : index
    %36 = vector.load %arg6[%c0_43, %c19, %c0_44] : memref<2x53x128xbf16, #tpu.memory_space<vmem>>, vector<2x32x128xbf16>
    %37 = tpu.concatenate %35, %36 in 2 : vector<2x32x128xbf16>, vector<2x32x128xbf16> -> vector<2x32x256xbf16>
    %38 = vector.shape_cast %37 : vector<2x32x256xbf16> to vector<64x256xbf16>
    %c3_45 = arith.constant 3 : index
    %c0_46 = arith.constant 0 : index
    %c0_47 = arith.constant 0 : index
    %39 = vector.load %arg2[%c3_45, %c0_46, %c0_47] : memref<5x256x128xbf16, #tpu.memory_space<vmem>>, vector<1x256x128xbf16>
    %40 = vector.shape_cast %39 : vector<1x256x128xbf16> to vector<256x128xbf16>
    %cst_48 = arith.constant dense<0.000000e+00> : vector<64x128xf32>
    %41 = tpu.matmul %38, %40, %cst_48 {dimension_numbers = #tpu.dot_dimension_numbers<[1], [0], [0], [1], [0, 0, 1, 1], [], []>} : vector<64x256xbf16>, vector<256x128xbf16>, vector<64x128xf32> -> vector<64x128xf32>
    %42 = arith.addf %34, %41 : vector<64x128xf32>
    %c0_49 = arith.constant 0 : index
    %c20 = arith.constant 20 : index
    %c0_50 = arith.constant 0 : index
    %43 = vector.load %arg6[%c0_49, %c20, %c0_50] : memref<2x53x128xbf16, #tpu.memory_space<vmem>>, vector<2x32x128xbf16>
    %c0_51 = arith.constant 0 : index
    %c21 = arith.constant 21 : index
    %c0_52 = arith.constant 0 : index
    %44 = vector.load %arg6[%c0_51, %c21, %c0_52] : memref<2x53x128xbf16, #tpu.memory_space<vmem>>, vector<2x32x128xbf16>
    %45 = tpu.concatenate %43, %44 in 2 : vector<2x32x128xbf16>, vector<2x32x128xbf16> -> vector<2x32x256xbf16>
    %46 = vector.shape_cast %45 : vector<2x32x256xbf16> to vector<64x256xbf16>
    %c4 = arith.constant 4 : index
    %c0_53 = arith.constant 0 : index
    %c0_54 = arith.constant 0 : index
    %47 = vector.load %arg2[%c4, %c0_53, %c0_54] : memref<5x256x128xbf16, #tpu.memory_space<vmem>>, vector<1x256x128xbf16>
    %48 = vector.shape_cast %47 : vector<1x256x128xbf16> to vector<256x128xbf16>
    %cst_55 = arith.constant dense<0.000000e+00> : vector<64x128xf32>
    %49 = tpu.matmul %46, %48, %cst_55 {dimension_numbers = #tpu.dot_dimension_numbers<[1], [0], [0], [1], [0, 0, 1, 1], [], []>} : vector<64x256xbf16>, vector<256x128xbf16>, vector<64x128xf32> -> vector<64x128xf32>
    %50 = arith.addf %42, %49 : vector<64x128xf32>
    %51 = vector.broadcast %6 : vector<1x128xf32> to vector<64x128xf32>
    %52 = arith.mulf %50, %51 : vector<64x128xf32>
    %53 = vector.broadcast %7 : vector<1x128xf32> to vector<64x128xf32>
    %54 = arith.addf %52, %53 : vector<64x128xf32>
    %cst_56 = arith.constant 0.000000e+00 : f32
    %55 = vector.broadcast %cst_56 : f32 to vector<64x128xf32>
    %56 = arith.maximumf %54, %55 : vector<64x128xf32>
    %57 = arith.truncf %56 : vector<64x128xf32> to vector<64x128xbf16>
    %58 = vector.shape_cast %57 : vector<64x128xbf16> to vector<2x32x128xbf16>
    %c0_57 = arith.constant 0 : index
    %c16_58 = arith.constant 16 : index
    %c0_59 = arith.constant 0 : index
    %59 = vector.load %arg6[%c0_57, %c16_58, %c0_59] : memref<2x53x128xbf16, #tpu.memory_space<vmem>>, vector<2x32x128xbf16>
    tpu.vector_store %arg6[%c0_57, %c16_58, %c0_59], %58 {strides = array<i32>} : memref<2x53x128xbf16, #tpu.memory_space<vmem>>, vector<2x32x128xbf16>,
    %60 = arith.extf %4 : vector<2x32x128xbf16> to vector<2x32x128xf32>
    %61 = vector.shape_cast %60 : vector<2x32x128xf32> to vector<64x128xf32>
    %cst_60 = arith.constant 0.000000e+00 : f32
    %62 = vector.broadcast %cst_60 : f32 to vector<64x128xf32>
    %c0_61 = arith.constant 0 : index
    %c12_62 = arith.constant 12 : index
    %c0_63 = arith.constant 0 : index
    %63 = vector.load %arg6[%c0_61, %c12_62, %c0_63] : memref<2x53x128xbf16, #tpu.memory_space<vmem>>, vector<2x32x128xbf16>
    %c0_64 = arith.constant 0 : index
    %c13_65 = arith.constant 13 : index
    %c0_66 = arith.constant 0 : index
    %64 = vector.load %arg6[%c0_64, %c13_65, %c0_66] : memref<2x53x128xbf16, #tpu.memory_space<vmem>>, vector<2x32x128xbf16>
    %65 = tpu.concatenate %63, %64 in 2 : vector<2x32x128xbf16>, vector<2x32x128xbf16> -> vector<2x32x256xbf16>
    %66 = vector.shape_cast %65 : vector<2x32x256xbf16> to vector<64x256xbf16>
    %c0_67 = arith.constant 0 : index
    %c0_68 = arith.constant 0 : index
    %c0_69 = arith.constant 0 : index
    %67 = vector.load %arg3[%c0_67, %c0_68, %c0_69] : memref<5x256x128xbf16, #tpu.memory_space<vmem>>, vector<1x256x128xbf16>
    %68 = vector.shape_cast %67 : vector<1x256x128xbf16> to vector<256x128xbf16>
    %cst_70 = arith.constant dense<0.000000e+00> : vector<64x128xf32>
    %69 = tpu.matmul %66, %68, %cst_70 {dimension_numbers = #tpu.dot_dimension_numbers<[1], [0], [0], [1], [0, 0, 1, 1], [], []>} : vector<64x256xbf16>, vector<256x128xbf16>, vector<64x128xf32> -> vector<64x128xf32>
    %70 = arith.addf %62, %69 : vector<64x128xf32>
    %c0_71 = arith.constant 0 : index
    %c14_72 = arith.constant 14 : index
    %c0_73 = arith.constant 0 : index
    %71 = vector.load %arg6[%c0_71, %c14_72, %c0_73] : memref<2x53x128xbf16, #tpu.memory_space<vmem>>, vector<2x32x128xbf16>
    %c0_74 = arith.constant 0 : index
    %c15_75 = arith.constant 15 : index
    %c0_76 = arith.constant 0 : index
    %72 = vector.load %arg6[%c0_74, %c15_75, %c0_76] : memref<2x53x128xbf16, #tpu.memory_space<vmem>>, vector<2x32x128xbf16>
    %73 = tpu.concatenate %71, %72 in 2 : vector<2x32x128xbf16>, vector<2x32x128xbf16> -> vector<2x32x256xbf16>
    %74 = vector.shape_cast %73 : vector<2x32x256xbf16> to vector<64x256xbf16>
    %c1_77 = arith.constant 1 : index
    %c0_78 = arith.constant 0 : index
    %c0_79 = arith.constant 0 : index
    %75 = vector.load %arg3[%c1_77, %c0_78, %c0_79] : memref<5x256x128xbf16, #tpu.memory_space<vmem>>, vector<1x256x128xbf16>
    %76 = vector.shape_cast %75 : vector<1x256x128xbf16> to vector<256x128xbf16>
    %cst_80 = arith.constant dense<0.000000e+00> : vector<64x128xf32>
    %77 = tpu.matmul %74, %76, %cst_80 {dimension_numbers = #tpu.dot_dimension_numbers<[1], [0], [0], [1], [0, 0, 1, 1], [], []>} : vector<64x256xbf16>, vector<256x128xbf16>, vector<64x128xf32> -> vector<64x128xf32>
    %78 = arith.addf %70, %77 : vector<64x128xf32>
    %c0_81 = arith.constant 0 : index
    %c16_82 = arith.constant 16 : index
    %c0_83 = arith.constant 0 : index
    %79 = vector.load %arg6[%c0_81, %c16_82, %c0_83] : memref<2x53x128xbf16, #tpu.memory_space<vmem>>, vector<2x32x128xbf16>
    %c0_84 = arith.constant 0 : index
    %c17_85 = arith.constant 17 : index
    %c0_86 = arith.constant 0 : index
    %80 = vector.load %arg6[%c0_84, %c17_85, %c0_86] : memref<2x53x128xbf16, #tpu.memory_space<vmem>>, vector<2x32x128xbf16>
    %81 = tpu.concatenate %79, %80 in 2 : vector<2x32x128xbf16>, vector<2x32x128xbf16> -> vector<2x32x256xbf16>
    %82 = vector.shape_cast %81 : vector<2x32x256xbf16> to vector<64x256xbf16>
    %c2_87 = arith.constant 2 : index
    %c0_88 = arith.constant 0 : index
    %c0_89 = arith.constant 0 : index
    %83 = vector.load %arg3[%c2_87, %c0_88, %c0_89] : memref<5x256x128xbf16, #tpu.memory_space<vmem>>, vector<1x256x128xbf16>
    %84 = vector.shape_cast %83 : vector<1x256x128xbf16> to vector<256x128xbf16>
    %cst_90 = arith.constant dense<0.000000e+00> : vector<64x128xf32>
    %85 = tpu.matmul %82, %84, %cst_90 {dimension_numbers = #tpu.dot_dimension_numbers<[1], [0], [0], [1], [0, 0, 1, 1], [], []>} : vector<64x256xbf16>, vector<256x128xbf16>, vector<64x128xf32> -> vector<64x128xf32>
    %86 = arith.addf %78, %85 : vector<64x128xf32>
    %c0_91 = arith.constant 0 : index
    %c18_92 = arith.constant 18 : index
    %c0_93 = arith.constant 0 : index
    %87 = vector.load %arg6[%c0_91, %c18_92, %c0_93] : memref<2x53x128xbf16, #tpu.memory_space<vmem>>, vector<2x32x128xbf16>
    %c0_94 = arith.constant 0 : index
    %c19_95 = arith.constant 19 : index
    %c0_96 = arith.constant 0 : index
    %88 = vector.load %arg6[%c0_94, %c19_95, %c0_96] : memref<2x53x128xbf16, #tpu.memory_space<vmem>>, vector<2x32x128xbf16>
    %89 = tpu.concatenate %87, %88 in 2 : vector<2x32x128xbf16>, vector<2x32x128xbf16> -> vector<2x32x256xbf16>
    %90 = vector.shape_cast %89 : vector<2x32x256xbf16> to vector<64x256xbf16>
    %c3_97 = arith.constant 3 : index
    %c0_98 = arith.constant 0 : index
    %c0_99 = arith.constant 0 : index
    %91 = vector.load %arg3[%c3_97, %c0_98, %c0_99] : memref<5x256x128xbf16, #tpu.memory_space<vmem>>, vector<1x256x128xbf16>
    %92 = vector.shape_cast %91 : vector<1x256x128xbf16> to vector<256x128xbf16>
    %cst_100 = arith.constant dense<0.000000e+00> : vector<64x128xf32>
    %93 = tpu.matmul %90, %92, %cst_100 {dimension_numbers = #tpu.dot_dimension_numbers<[1], [0], [0], [1], [0, 0, 1, 1], [], []>} : vector<64x256xbf16>, vector<256x128xbf16>, vector<64x128xf32> -> vector<64x128xf32>
    %94 = arith.addf %86, %93 : vector<64x128xf32>
    %c0_101 = arith.constant 0 : index
    %c20_102 = arith.constant 20 : index
    %c0_103 = arith.constant 0 : index
    %95 = vector.load %arg6[%c0_101, %c20_102, %c0_103] : memref<2x53x128xbf16, #tpu.memory_space<vmem>>, vector<2x32x128xbf16>
    %c0_104 = arith.constant 0 : index
    %c21_105 = arith.constant 21 : index
    %c0_106 = arith.constant 0 : index
    %96 = vector.load %arg6[%c0_104, %c21_105, %c0_106] : memref<2x53x128xbf16, #tpu.memory_space<vmem>>, vector<2x32x128xbf16>
    %97 = tpu.concatenate %95, %96 in 2 : vector<2x32x128xbf16>, vector<2x32x128xbf16> -> vector<2x32x256xbf16>
    %98 = vector.shape_cast %97 : vector<2x32x256xbf16> to vector<64x256xbf16>
    %c4_107 = arith.constant 4 : index
    %c0_108 = arith.constant 0 : index
    %c0_109 = arith.constant 0 : index
    %99 = vector.load %arg3[%c4_107, %c0_108, %c0_109] : memref<5x256x128xbf16, #tpu.memory_space<vmem>>, vector<1x256x128xbf16>
    %100 = vector.shape_cast %99 : vector<1x256x128xbf16> to vector<256x128xbf16>
    %cst_110 = arith.constant dense<0.000000e+00> : vector<64x128xf32>
    %101 = tpu.matmul %98, %100, %cst_110 {dimension_numbers = #tpu.dot_dimension_numbers<[1], [0], [0], [1], [0, 0, 1, 1], [], []>} : vector<64x256xbf16>, vector<256x128xbf16>, vector<64x128xf32> -> vector<64x128xf32>
    %102 = arith.addf %94, %101 : vector<64x128xf32>
    %103 = vector.broadcast %8 : vector<1x128xf32> to vector<64x128xf32>
    %104 = arith.mulf %102, %103 : vector<64x128xf32>
    %105 = vector.broadcast %9 : vector<1x128xf32> to vector<64x128xf32>
    %106 = arith.addf %104, %105 : vector<64x128xf32>
    %107 = arith.addf %106, %61 : vector<64x128xf32>
    %cst_111 = arith.constant 0.000000e+00 : f32
    %108 = vector.broadcast %cst_111 : f32 to vector<64x128xf32>
    %109 = arith.maximumf %107, %108 : vector<64x128xf32>
    %110 = vector.shape_cast %109 : vector<64x128xf32> to vector<2x32x128xf32>
    %111 = arith.truncf %110 : vector<2x32x128xf32> to vector<2x32x128xbf16>
    %c0_112 = arith.constant 0 : index
    %c0_113 = arith.constant 0 : index
    %c0_114 = arith.constant 0 : index
    %112 = vector.load %arg5[%c0_112, %c0_113, %c0_114] : memref<2x32x128xbf16, #tpu.memory_space<vmem>>, vector<2x32x128xbf16>
    tpu.vector_store %arg5[%c0_112, %c0_113, %c0_114], %111 {strides = array<i32>} : memref<2x32x128xbf16, #tpu.memory_space<vmem>>, vector<2x32x128xbf16>,
    return
  }
  func.func @transform_0(%arg0: i32) -> (i32, i32, i32) {
    %c0_i32 = arith.constant 0 : i32
    %c0_i32_0 = arith.constant 0 : i32
    %c0_i32_1 = arith.constant 0 : i32
    return %arg0, %c0_i32, %c0_i32_0 : i32, i32, i32
  }
  func.func @transform_1(%arg0: i32) -> (i32, i32, i32) {
    %c0_i32 = arith.constant 0 : i32
    %c0_i32_0 = arith.constant 0 : i32
    %c0_i32_1 = arith.constant 0 : i32
    %c0_i32_2 = arith.constant 0 : i32
    return %c0_i32, %c0_i32_0, %c0_i32_1 : i32, i32, i32
  }
  func.func @transform_2(%arg0: i32) -> (i32, i32, i32) {
    %c0_i32 = arith.constant 0 : i32
    %c0_i32_0 = arith.constant 0 : i32
    %c0_i32_1 = arith.constant 0 : i32
    %c0_i32_2 = arith.constant 0 : i32
    return %c0_i32, %c0_i32_0, %c0_i32_1 : i32, i32, i32
  }
  func.func @transform_3(%arg0: i32) -> (i32, i32) {
    %c0_i32 = arith.constant 0 : i32
    %c0_i32_0 = arith.constant 0 : i32
    %c0_i32_1 = arith.constant 0 : i32
    return %c0_i32, %c0_i32_0 : i32, i32
  }
  func.func @transform_4(%arg0: i32) -> (i32, i32, i32) {
    %c0_i32 = arith.constant 0 : i32
    %c0_i32_0 = arith.constant 0 : i32
    %c0_i32_1 = arith.constant 0 : i32
    return %arg0, %c0_i32, %c0_i32_0 : i32, i32, i32
  }
}

</mosaic_0001>

<bundles_post_ra>
// kernel: tpu_custom_call.1
= control target key start
LH: loop header
LB: loop body
LE: loop exit
PB: predicated region body
PF: predicated region fallthrough
CT: control target
= control target key end

     0   :  { %9 = vsyncpa [#allocation4], 0  ;;  %s5498_s0 = inlined_call_operand.hbm [shape: bf16[6,32,128], index: 0, kind: input, shape index: {}]   ;;  %s5499_s1 = inlined_call_operand.hbm [shape: bf16[5,256,128], index: 1, kind: input, shape index: {}]   ;;  %s5500_s2 = inlined_call_operand.hbm [shape: bf16[5,256,128], index: 2, kind: input, shape index: {}]   ;;  %s5501_s3 = inlined_call_operand.vmem [shape: f32[4,128], index: 3, kind: input, shape index: {}]   ;;  %s5502_s4 = inlined_call_operand.hbm [shape: bf16[6,32,128], index: 4, kind: output, shape index: {}]  }
   0x1   :  { %11 = vsyncpa [#allocation4 + $0x1], 0 }
   0x2   :  { %12 = vsyncpa [#allocation7], 0 }
   0x3   :  { %13 = vsyncpa [#allocation5], 0 }
   0x4   :  { %15 = vsyncpa [#allocation5 + $0x1], 0  ;;  %s4603_s15 = smov 0   ;;  %s4605_s16 = smov 0  }
   0x5   :  { %s4607_s17 = smov 0   ;;  %s4609_s18 = smov 0  }
   0x6 LB: > { %s4624_s19 = sadd.s32 4294967295, %s4567_s18   ;;  %s3407_s20 = sadd.s32 4294967294, %s4567_s18   ;;  %s4567_s18 = sphi %s4609_s18, %s5576_s18   ;;  %s4563_s17 = sphi %s4607_s17, %s5575_s17   ;;  %s4559_s16 = sphi %s4605_s16, %s5574_s16   ;;  %s4555_s15 = sphi %s4603_s15, %s5573_s15  }
   0x7   : > { %p41_p0 = scmp.ne.s32.totalorder %s4559_s16, %s4555_s15  ;;  %p5503_p1 = scmp.eq.s32.totalorder %s4624_s19, 0 }
   0x8   : > { %p128_p2 = scmp.eq.s32.totalorder %s4624_s19, 2  ;;  %p134_p3 = scmp.eq.s32.totalorder %s3407_s20, 2 }
   0x9   : > { %p4633_p4 = por %p5503_p1, %p41_p0  ;;  %p3408_p5 = scmp.ge.s32.totalorder %s4567_s18, 1 }
   0xa   : > { %p4638_p6 = por %p134_p3, %p41_p0  ;;  %p141_p7 = scmp.lt.s32.totalorder %s4567_s18, 4 }
   0xb   : > { %s5515_s21 = scalar_select %p4633_p4, 1, 0 }
   0xc   : > { %s5516_s22 = scalar_select %p4638_p6, 1, 0 }
   0xd   : > { %p4643_p8 = pnand %p3408_p5, %p141_p7  ;;  %s4569_s24 = smov [#allocation6]  }
   0xe   : > { %s153_s25 = sshll.u32 %s4569_s24, 4  ;;  %s4570_s27 = smov [#allocation8]   ;;  %s154_s25 = int_to_ptr.vmem [resolvable:$true] %s153_s25 }
   0xf   : > { %s5517_s23 = scalar_select %p4643_p8, 1, 0 }
  0x10   : > { %p4140_p9 = pneg %p4643_p8  ;;  %s166_s28 = sshll.u32 %s4570_s27, 4  ;;  %s167_s28 = int_to_ptr.vmem [resolvable:$true] %s166_s28 }
  0x11   : > { %s4430_s29 = scalar_lea.vmem %s154_s25, 10240  ;;  %p4438_p3 = scmp.lt.s32.totalorder %s154_s25, %s154_s25 }
  0x12   : > { %p4651_p10 = pnand %p4140_p9, %p5503_p1  ;;  %p4431_p12 = scmp.ne.s32.totalorder %s154_s25, %s4430_s29 }
  0x13   : > { %p4439_p5 = scmp.lt.s32.totalorder %s4430_s29, %s4430_s29 }
  0x14   : > { %p4421_p11 = pneg %p4651_p10 }
  0x15   : > { %p4440_p7 = por %p4439_p5, %p4438_p3 }
  0x16   : > { %p4433_p13 = pnand %p4431_p12, %p4421_p11 }
  0x18   : > { %p4434_p0 = pneg %p4433_p13 }
  0x1a   : > { %p4441_p9 = pnand %p4440_p7, %p4434_p0 }
  0x1c   : > { %4444 = shalt.err (!%p4441_p9)
}
  0x1d   : > { %s4571_s30 = smov 64   ;;  %s4572_s5 = smov 4  }
  0x1e   : > { %4143 = dma.hbm_to_vmem [thread:$0]  (!%p4651_p10), %s5499_s1, 10240, %s154_s25, [#allocation7], %s4571_s30, %s4571_s30, %s4572_s5  }
  0x1f   : > { %s4456_s8 = scalar_lea.vmem %s167_s28, 10240  ;;  %p4464_p0 = scmp.lt.s32.totalorder %s167_s28, %s167_s28 }
  0x20   : > { %p4457_p12 = scmp.ne.s32.totalorder %s167_s28, %s4456_s8  ;;  %p4465_p5 = scmp.lt.s32.totalorder %s4456_s8, %s4456_s8 }
  0x22   : > { %p4459_p13 = pnand %p4457_p12, %p4421_p11  ;;  %p4466_p7 = por %p4465_p5, %p4464_p0 }
  0x24   : > { %p4460_p3 = pneg %p4459_p13 }
  0x26   : > { %p4467_p9 = pnand %p4466_p7, %p4460_p3 }
  0x28   : > { %4470 = shalt.err (!%p4467_p9)
}
  0x29   : > { %4146 = dma.hbm_to_vmem [thread:$0]  (!%p4651_p10), %s5500_s2, 10240, %s167_s28, [#allocation7], %s4571_s30, %s4571_s30, %s4572_s5  }
  0x2a   : > { %s4680_s11 = sadd.s32 1, %s4567_s18   ;;  %s28_s12 = sadd.s32 1, %s4563_s17 }
  0x2b   : > { %s25_s13 = ssub.s32 %s4567_s18, %s4680_s11  ;;  %p35_p11 = scmp.ne.s32.totalorder %s4563_s17, %s4559_s16 }
  0x2c   : > { %p26_p12 = scmp.eq.s32.totalorder %s25_s13, 0  ;;  %p36_p13 = scmp.eq.s32.totalorder %s4567_s18, 0 }
  0x2d   : > { %p4690_p3 = por %p128_p2, %p35_p11  ;;  %p4157_p0 = scmp.lt.s32.totalorder %s4567_s18, 3 }
  0x2e   : > { %s4696_s20 = scalar_select %p26_p12, %s4563_s17, %s28_s12  }
  0x2f   : > { %s5519_s14 = scalar_select %p4690_p3, 1, 0 }
  0x30   : > { %p37_p5 = por %p36_p13, %p35_p11  ;;  %s183_s24 = sand.u32 1, %s4563_s17  }
  0x31   : > { %s3412_s25 = sshll.u32 %s183_s24, 5  ;;  %s3668_s26 = sshll.u32 %s4567_s18, 9 }
  0x32   : > { %s4703_s29 = scalar_lea.hbm %s5498_s0, %s3668_s26  ;;  %s187_s6 = scalar_lea.vmem [#allocation3], %s3412_s25 }
  0x33   : > { %s195_s7 = sshll.u32 %s187_s6, 4  ;;  %p4707_p2 = pnand %p4157_p0, %p37_p5  ;;  %s4705_s7 = int_to_ptr.vmem [resolvable:$true] %s195_s7 }
  0x34   : > { %s4711_s9 = scalar_lea.sflag [#allocation4], %s183_s24  ;;  %s4471_s10 = scalar_lea.hbm %s4703_s29, 512 }
  0x35   : > { %p4472_p10 = scmp.ne.s32.totalorder %s4703_s29, %s4471_s10  ;;  %p4473_p7 = pneg %p4707_p2 }
  0x36   : > { %s4476_s25 = scalar_lea.hbm %s5498_s0, 1536  ;;  %p4477_p12 = scmp.lt.s32.totalorder %s4703_s29, %s5498_s0 }
  0x37   : > { %p4474_p9 = pnand %p4473_p7, %p4472_p10  ;;  %p4478_p13 = scmp.lt.s32.totalorder %s4476_s25, %s4471_s10 }
  0x39   : > { %p4475_p11 = pneg %p4474_p9  ;;  %p4479_p0 = por %p4478_p13, %p4477_p12 }
  0x3b   : > { %p4480_p5 = pnand %p4479_p0, %p4475_p11 }
  0x3d   : > { %4483 = shalt.err (!%p4480_p5)
}
  0x3e   : > { %s4484_s24 = scalar_lea.vmem %s4705_s7, 512  ;;  %s4573_s28 = smov [#allocation3]  }
  0x3f   : > { %p4485_p1 = scmp.ne.s32.totalorder %s4705_s7, %s4484_s24  ;;  %s4489_s6 = sshll.u32 %s4573_s28, 4  ;;  %s4490_s6 = int_to_ptr.vmem [resolvable:$false] %s4489_s6 }
  0x40   : > { %s4491_s12 = scalar_lea.vmem %s4490_s6, 1024  ;;  %p4492_p9 = scmp.lt.s32.totalorder %s4705_s7, %s4490_s6 }
  0x41   : > { %p4487_p6 = pnand %p4485_p1, %p4473_p7  ;;  %p4493_p3 = scmp.lt.s32.totalorder %s4491_s12, %s4484_s24 }
  0x43   : > { %p4488_p10 = pneg %p4487_p6  ;;  %p4494_p4 = por %p4493_p3, %p4492_p9 }
  0x45   : > { %p4495_p8 = pnand %p4494_p4, %p4488_p10 }
  0x47   : > { %4498 = shalt.err (!%p4495_p8)
}
  0x48   : > { %4150 = dma.hbm_to_vmem [thread:$0]  (!%p4707_p2), %s4703_s29, 512, %s4705_s7, %s4711_s9, %s4571_s30, %s4571_s30, %s4572_s5  }
  0x49   : > { %p5521_p1 = scmp.ne.s32.totalorder %s5517_s23, 0 }
  0x4b   : > { %207 = sbr.rel (%p5521_p1) target bundleno = 749 (0x2ed), region = 36 }
  0x50   : > { %s4738_s10 = sand.u32 1, %s4559_s16   ;;  %p5522_p4 = scmp.ne.s32.totalorder %s5515_s21, 0 }
  0x51   : > { %s3417_s13 = sshll.u32 %s4738_s10, 5  ;;  %s210_s25 = scalar_lea.sflag [#allocation4], %s4738_s10 }
  0x52   : > { %s4744_s8 = scalar_lea.vmem [#allocation3], %s3417_s13 }
  0x53   : > { %4542 = dma.done.wait (%p5522_p4), %s210_s25, 512  }
  0x54   : > { %4544 = vsyncadd (%p5522_p4), %s210_s25, 4294966784  ;;  %p5523_p6 = scmp.eq.s32.totalorder %s4624_s19, 0 }
  0x56   : > { %4546 = dma.done.wait (%p5523_p6), [#allocation7], 20480   ;;  %p5524_p8 = pmov %p5523_p6 }
  0x57   : > { %v4574_v0 = vmov 0   ;;  %v4200_v1 = vld [vmem:[#allocation6 + $0xf8] sm:$0xff]   ;;  %v4204_v5 = vld [vmem:[#allocation6 + $0xf0] sm:$0xff]   ;;  %v4208_v9 = vld [vmem:[#allocation6 + $0xe8] sm:$0xff]   ;;  %vm326_vm0 = vsmask.f32 7424 }
  0x58   : > { %4548 = vsyncadd (%p5524_p8), [#allocation7], 4294946816  ;;  %250 = vst [vmem:[#allocation2 + $0x4] sm:$0xf] %v4574_v0  ;;  %v4201_v2 = vld [vmem:[#allocation6 + $0x78] sm:$0xff]   ;;  %3728 = vmatprep.subr.bf16.mxu0 %v4200_v1  ;;  %v4205_v6 = vld [vmem:[#allocation6 + $0x70] sm:$0xff]  }
  0x59   : > { %252 = vst [vmem:[#allocation2 + $0x20] sm:$0xf] %v4574_v0  ;;  %v4202_v3 = vld [vmem:[#allocation6 + $0xb8] sm:$0xff]   ;;  %3768 = vmatprep.subr.bf16.mxu1 %v4201_v2  ;;  %v4206_v7 = vld [vmem:[#allocation6 + $0xb0] sm:$0xff]   ;;  %v4209_v10 = vld [vmem:[#allocation6 + $0x68] sm:$0xff]   ;;  %vm482_vm1 = vcmask 1044480  }
  0x5a   : > { %v4203_v4 = vld [vmem:[#allocation6 + $0x38] sm:$0xff]   ;;  %3729 = vmatpush3.bf16.msra.mxu0 %v4202_v3  ;;  %v4207_v8 = vld [vmem:[#allocation6 + $0x30] sm:$0xff]   ;;  %v4210_v11 = vld [vmem:[#allocation6 + $0xa8] sm:$0xff]   ;;  %vm373_vm2 = vcmask 1045504   ;;  %vm253_vm3 = vcmask 1042432   ;;  %vm1204_vm6 = vcmask 1046528  }
  0x5b   : > { %3769 = vmatpush3.bf16.msra.mxu1 %v4203_v4  ;;  %3730 = vmatprep.subr.bf16.mxu0 %v4204_v5  ;;  %v4211_v12 = vld [vmem:[#allocation6 + $0x28] sm:$0xff]   ;;  %v4212_v13 = vld [vmem:[#allocation6 + $0xe0] sm:$0xff]   ;;  %v4216_v17 = vld [vmem:[#allocation6 + $0xd8] sm:$0xff]   ;;  %vm254_vm4 = vsmask.f32 2304  ;;  %s5428_s27 = scalar_lea.vmem [#allocation9], %s3417_s13 }
  0x5c   : > { %3770 = vmatprep.subr.bf16.mxu1 %v4205_v6  ;;  %v4213_v14 = vld [vmem:[#allocation6 + $0x60] sm:$0xff]   ;;  %v4217_v18 = vld [vmem:[#allocation6 + $0x58] sm:$0xff]   ;;  %v4220_v21 = vld [vmem:[#allocation6 + $0xd0] sm:$0xff]   ;;  %s3686_s24 = sshll.u32 %s4624_s19, 9  ;;  %s3315_s28 = sshll.u32 %s5428_s27, 4  ;;  %s5455_s28 = int_to_ptr.vmem [resolvable:$true] %s3315_s28 }
  0x5d   : > { %v4214_v15 = vld [vmem:[#allocation6 + $0xa0] sm:$0xff]   ;;  %v4218_v19 = vld [vmem:[#allocation6 + $0x98] sm:$0xff]   ;;  %v4221_v22 = vld [vmem:[#allocation6 + $0x50] sm:$0xff]   ;;  %s5453_s13 = scalar_lea.hbm %s5502_s4, %s3686_s24  ;;  %s3301_s25 = scalar_lea.sflag [#allocation5], %s4738_s10 }
  0x5e   : > { %3731 = vmatpush3.bf16.msra.mxu0 %v4206_v7  ;;  %v4215_v16 = vld [vmem:[#allocation6 + $0x20] sm:$0xff]   ;;  %v4219_v20 = vld [vmem:[#allocation6 + $0x18] sm:$0xff]   ;;  %v4222_v23 = vld [vmem:[#allocation6 + $0x90] sm:$0xff]   ;;  %p5571_p2 = scmp.ne.s32.totalorder %s5519_s14, 0  ;;  %s4575_s19 = smov [#allocation9]  }
  0x5f   : > { %3771 = vmatpush3.bf16.msra.mxu1 %v4207_v8  ;;  %3732 = vmatprep.subr.bf16.mxu0 %v4208_v9  ;;  %v4223_v24 = vld [vmem:[#allocation6 + $0x10] sm:$0xff]   ;;  %v4224_v25 = vld [vmem:[#allocation6 + $0xc8] sm:$0xff]   ;;  %v4228_v29 = vld [vmem:[#allocation6 + $0xc0] sm:$0xff]   ;;  %s4503_s21 = sshll.u32 %s4575_s19, 4  ;;  %s4504_s21 = int_to_ptr.vmem [resolvable:$false] %s4503_s21 }
  0x60   : > { %3772 = vmatprep.subr.bf16.mxu1 %v4209_v10  ;;  %v4225_v26 = vld [vmem:[#allocation6 + $0x48] sm:$0xff]   ;;  %v4229_v30 = vld [vmem:[#allocation6 + $0x40] sm:$0xff]   ;;  %v4237_v37 = vld [vmem:[#allocation6 + $0x178] sm:$0xff]   ;;  %s4505_s23 = scalar_lea.vmem %s4504_s21, 1024  ;;  %p4506_p12 = scmp.lt.s32.totalorder %s5455_s28, %s4504_s21 }
  0x61   : > { %v4226_v27 = vld [vmem:[#allocation6 + $0x88] sm:$0xff]   ;;  %v4230_v31 = vld [vmem:[#allocation6 + $0x80] sm:$0xff]   ;;  %v4239_v38 = vld [vmem:[#allocation6 + $0x1f8] sm:$0xff]  }
  0x62   : > { %3733 = vmatpush3.bf16.msra.mxu0 %v4210_v11  ;;  %v4227_v28 = vld [vmem:[#allocation6 + $0x8] sm:$0xff]   ;;  %v4231_v32 = vld [vmem:[#allocation6] sm:$0xff]   ;;  %v4238_v11 = vld [vmem:[#allocation6 + $0x138] sm:$0xff]  }
  0x63   : > { %3773 = vmatpush3.bf16.msra.mxu1 %v4211_v12  ;;  %3734 = vmatprep.subr.bf16.mxu0 %v4212_v13  ;;  %v4755_v33 = vld [vmem:[%s4744_s8] sm:$0xf]  ;;  %v4758_v34 = vld [vmem:[%s4744_s8 + $0x4] sm:$0xf]  ;;  %v4761_v35 = vld [vmem:[%s4744_s8 + $0x8] sm:$0xf] }
  0x64   : > { %3774 = vmatprep.subr.bf16.mxu1 %v4213_v14  ;;  %5525 = vst [vmem:[#allocation13_spill] sm:$0xff] %v4755_v33  ;;  %5526 = vst [vmem:[#allocation14_spill] sm:$0xff] %v4758_v34  ;;  %v4764_v36 = vld [vmem:[%s4744_s8 + $0xc] sm:$0xf] }
  0x65   : > { %5527 = vst [vmem:[#allocation15_spill] sm:$0xff] %v4761_v35  ;;  %5528 = vst [vmem:[#allocation16_spill] sm:$0xff] %v4764_v36  ;;  %v434_v39 = vld [vmem:[#allocation2 + $0x4] sm:$0x8] }
  0x66   : > { %3735 = vmatpush3.bf16.msra.mxu0 %v4214_v15  ;;  %270 = vst [vmem:[#allocation2 + $0x8] sm:$0xf] %v4755_v33  ;;  %271 = vst [vmem:[#allocation2 + $0xc] sm:$0xf] %v4758_v34  ;;  %v282_v40 = vld [vmem:[#allocation2 + $0x4] sm:$0xc] }
  0x67   : > { %3775 = vmatpush3.bf16.msra.mxu1 %v4215_v16  ;;  %3736 = vmatprep.subr.bf16.mxu0 %v4216_v17  ;;  %272 = vst [vmem:[#allocation2 + $0x10] sm:$0xf] %v4761_v35  ;;  %273 = vst [vmem:[#allocation2 + $0x14] sm:$0xf] %v4764_v36  ;;  %v4240_v16 = vld [vmem:[#allocation6 + $0x1b8] sm:$0xff]  }
  0x68   : > { %3776 = vmatprep.subr.bf16.mxu1 %v4217_v18  ;;  %vm4857_vm5 = vmand %vm253_vm3, %vm254_vm4 }
  0x6a   : > { %3737 = vmatpush3.bf16.msra.mxu0 %v4218_v19 }
  0x6b   : > { %3777 = vmatpush3.bf16.msra.mxu1 %v4219_v20  ;;  %3738 = vmatprep.subr.bf16.mxu0 %v4220_v21  ;;  %v4241_v20 = vld [vmem:[#allocation6 + $0x170] sm:$0xff]  }
  0x6c   : > { %3778 = vmatprep.subr.bf16.mxu1 %v4221_v22 }
  0x6d   : > { %v4770_v41 = vld [vmem:[#allocation2 + $0x8] sm:$0xf]  ;;  %v4772_v42 = vld [vmem:[#allocation2 + $0xc] sm:$0xf] }
  0x6e   : > { %3739 = vmatpush3.bf16.msra.mxu0 %v4222_v23  ;;  %v4774_v43 = vld [vmem:[#allocation2 + $0x10] sm:$0xf]  ;;  %v4780_v45 = vld [vmem:[#allocation2 + $0x14] sm:$0xf]  ;;  %v3429_v46 = vcombine.low %v434_v39, %v4770_v41  ;;  %v3421_v47 = vcombine.low %v282_v40, %v4770_v41  ;;  %v4809_v39 = vld [vmem:[%s4744_s8 + $0x14] sm:$0xf] }
  0x6f   : > { %3779 = vmatpush3.bf16.msra.mxu1 %v4223_v24  ;;  %3740 = vmatprep.subr.bf16.mxu0 %v4224_v25  ;;  %v4778_v44 = vcombine.low %v4772_v42, %v4774_v43  ;;  %v3431_v48 = vcombine.low %v4780_v45, %v4780_v45  ;;  %v4786_v49 = vld [vmem:[#allocation2 + $0x14] ss:$0 sps:$4 sm:$0x77]   ;;  %v4243_v25 = vld [vmem:[#allocation6 + $0x1f0] sm:$0xff]   ;;  %5530 = vst [vmem:[#allocation18_spill] sm:$0xff] %v4809_v39 }
  0x70   : > { %3780 = vmatprep.subr.bf16.mxu1 %v4225_v26  ;;  %v451_v52 = vshrl.u32 %v3429_v46, 16  ;;  %v453_v53 = vshll.u32 %v3429_v46, 16  ;;  %v328_v55 = vshrl.u32 %v3421_v47, 16  ;;  %v330_v56 = vshll.u32 %v3421_v47, 16  ;;  %275 = vst [vmem:[#allocation2 + $0x28] sm:$0xf] %v4809_v39 }
  0x71   : > { %v335_v50 = vshll.u32 %v4778_v44, 16  ;;  %v339_v51 = vshrl.u32 %v4778_v44, 16  ;;  %v459_v54 = vshll.u32 %v3431_v48, 16  ;;  %v343_v57 = vshll.u32 %v4786_v49, 16 }
  0x72   : > { %3741 = vmatpush3.bf16.msra.mxu0 %v4226_v27  ;;  %v455_v59 = vrot.slane %v453_v53, 1  ;;  %v332_v61 = vrot.slane %v330_v56, 1  ;;  %v483_v63 = vrot.slane %v3429_v46, 3  ;;  %v484_v2 = vrot.slane %v4778_v44, 3  ;;  %v4812_v46 = vld [vmem:[%s4744_s8 + $0x18] sm:$0xf] }
  0x73   : > { %3781 = vmatpush3.bf16.msra.mxu1 %v4227_v28  ;;  %3742 = vmatprep.subr.bf16.mxu0 %v4228_v29  ;;  %v337_v58 = vrot.slane %v335_v50, 1  ;;  %v461_v60 = vrot.slane %v459_v54, 1  ;;  %v345_v62 = vrot.slane %v343_v57, 1  ;;  %v374_v3 = vrot.slane %v3421_v47, 2  ;;  %v4242_v29 = vld [vmem:[#allocation6 + $0x130] sm:$0xff]   ;;  %5531 = vst [vmem:[#allocation19_spill] sm:$0xff] %v4812_v46 }
  0x74   : > { %3782 = vmatprep.subr.bf16.mxu1 %v4229_v30  ;;  %v456_v1 = vor.u32 %v455_v59, %v451_v52  ;;  %v333_v4 = vor.u32 %v332_v61, %v328_v55  ;;  %v375_v5 = vrot.slane %v4778_v44, 2  ;;  %v463_v6 = vshrl.u32 %v3431_v48, 16  ;;  %v4245_v17 = vld [vmem:[#allocation2 + $0x14] ss:$0 sps:$4 sm:$0x33]   ;;  %v4246_v44 = vld [vmem:[#allocation6 + $0x168] sm:$0xff]  }
  0x75   : > { %v341_v0 = vor.u32 %v339_v51, %v337_v58  ;;  %v347_v7 = vshrl.u32 %v4786_v49, 16  ;;  %v485_v19 = vsel %vm482_vm1, %v483_v63, %v484_v2  ;;  %v380_v40 = vrot.slane %v4245_v17, 2  ;;  %v4815_v47 = vld [vmem:[%s4744_s8 + $0x1c] sm:$0xf]  ;;  %v4247_v48 = vld [vmem:[#allocation6 + $0x128] sm:$0xff]   ;;  %v4250_v51 = vld [vmem:[#allocation6 + $0x160] sm:$0xff]  }
  0x76   : > { %3743 = vmatpush3.bf16.msra.mxu0 %v4230_v31  ;;  %v457_v8 = vsel %vm326_vm0, %v456_v1, %v337_v58  ;;  %v338_v14 = vsel %vm326_vm0, %v333_v4, %v337_v58  ;;  %v465_v21 = vor.u32 %v463_v6, %v461_v60  ;;  %v376_v24 = vsel %vm373_vm2, %v374_v3, %v375_v5  ;;  %v4249_v50 = vld [vmem:[#allocation6 + $0x1a8] sm:$0xff]   ;;  %v4252_v53 = vld [vmem:[#allocation6 + $0x1e0] sm:$0xff]   ;;  %v4259_v61 = vld [vmem:[#allocation6 + $0x158] sm:$0xff]  }
  0x77   : > { %3783 = vmatpush3.bf16.msra.mxu1 %v4231_v32  ;;  %3808 = vmatprep.subr.bf16.mxu0 %v4237_v37  ;;  %v462_v9 = vsel %vm326_vm0, %v341_v0, %v461_v60  ;;  %v346_v10 = vsel %vm326_vm0, %v341_v0, %v345_v62  ;;  %v486_v12 = vrot.slane %v457_v8, 3  ;;  %v377_v18 = vrot.slane %v338_v14, 2  ;;  %v4244_v32 = vld [vmem:[#allocation6 + $0x1b0] sm:$0xff]   ;;  %5532 = vst [vmem:[#allocation20_spill] sm:$0xff] %v4815_v47  ;;  %v435_v55 = vld [vmem:[#allocation2 + $0x20] sm:$0x8] }
  0x78   : > { %3848 = vmatprep.subr.bf16.mxu1 %v4239_v38  ;;  %v487_v13 = vrot.slane %v462_v9, 3  ;;  %v378_v15 = vrot.slane %v346_v10, 2  ;;  %v349_v22 = vor.u32 %v347_v7, %v345_v62  ;;  %v491_v27 = vrot.slane %v465_v21, 3  ;;  %v4806_v38 = vld [vmem:[%s4744_s8 + $0x10] sm:$0xf]  ;;  %v4251_v56 = vld [vmem:[#allocation6 + $0x120] sm:$0xff]  }
  0x79   : > { %v489_v37 = vrot.slane %v4786_v49, 3  ;;  %5529 = vst [vmem:[#allocation17_spill] sm:$0xff] %v4806_v38  ;;  %274 = vst [vmem:[#allocation2 + $0x24] sm:$0xf] %v4806_v38  ;;  %v4248_v49 = vld [vmem:[#allocation6 + $0x1e8] sm:$0xff]   ;;  %v381_v54 = vsel %vm373_vm2, %v375_v5, %v380_v40  ;;  %v4258_v58 = vld [vmem:[#allocation6 + $0x1a0] sm:$0xff]  }
  0x7a   : > { %v488_v23 = vsel %vm482_vm1, %v486_v12, %v487_v13  ;;  %v379_v26 = vsel %vm373_vm2, %v377_v18, %v378_v15  ;;  %v382_v28 = vrot.slane %v349_v22, 2  ;;  %v492_v30 = vsel %vm482_vm1, %v487_v13, %v491_v27  ;;  %276 = vst [vmem:[#allocation2 + $0x2c] sm:$0xf] %v4812_v46  ;;  %277 = vst [vmem:[#allocation2 + $0x30] sm:$0xf] %v4815_v47  ;;  %v4260_v5 = vld [vmem:[#allocation6 + $0x118] sm:$0xff]  }
  0x7b   : > { %672 = vmatprep.mubr.bf16.mxu0 %v488_v23  ;;  %833 = vmatprep.mubr.bf16.mxu1 %v379_v26  ;;  %v490_v52 = vsel %vm482_vm1, %v484_v2, %v489_v37  ;;  %v287_v57 = vld [vmem:[#allocation2 + $0x20] sm:$0xc]  ;;  %v4825_v60 = vld [vmem:[#allocation2 + $0x28] sm:$0xf]  ;;  %v4261_v6 = vld [vmem:[#allocation6 + $0x1d8] sm:$0xff]   ;;  %s4499_s8 = scalar_lea.vmem %s5455_s28, 512 }
  0x7c   : > { %673 = vmatmul.mubr.bf16.vlgmr.msra.gmra.mxu0 %v485_v19  ;;  %834 = vmatmul.mubr.bf16.vlgmr.msra.gmra.mxu1 %v376_v24  ;;  %v383_v31 = vsel %vm373_vm2, %v378_v15, %v382_v28  ;;  %v4262_v17 = vld [vmem:[#allocation6 + $0x198] sm:$0xff]   ;;  %v4263_v18 = vld [vmem:[#allocation6 + $0x150] sm:$0xff]   ;;  %p4500_p3 = scmp.ne.s32.totalorder %s5455_s28, %s4499_s8  ;;  %p4507_p13 = scmp.lt.s32.totalorder %s4505_s23, %s4499_s8 }
  0x7d   : > { %3809 = vmatpush3.bf16.msra.mxu0 %v4238_v11  ;;  %3849 = vmatpush3.bf16.msra.mxu1 %v4240_v16  ;;  %v4265_v23 = vld [vmem:[#allocation6 + $0x1d0] sm:$0xff]  }
  0x7e   : > { %3810 = vmatprep.subr.bf16.mxu0 %v4241_v20  ;;  %3850 = vmatprep.subr.bf16.mxu1 %v4243_v25  ;;  %p4501_p7 = pnand %p4500_p3, %p5571_p2  ;;  %p4508_p0 = por %p4507_p13, %p4506_p12 }
  0x7f   : > { %680 = vmatprep.mubr.bf16.mxu0 %v492_v30  ;;  %841 = vmatprep.mubr.bf16.mxu1 %v383_v31  ;;  %v4264_v30 = vld [vmem:[#allocation6 + $0x110] sm:$0xff]  }
  0x80   : > { %v4823_v59 = vld [vmem:[#allocation2 + $0x24] sm:$0xf]  ;;  %p4502_p11 = pneg %p4501_p7 }
  0x81   : > { %3811 = vmatpush3.bf16.msra.mxu0 %v4242_v29  ;;  %3851 = vmatpush3.bf16.msra.mxu1 %v4244_v32  ;;  %v4827_v62 = vld [vmem:[#allocation2 + $0x2c] sm:$0xf]  ;;  %v4829_v63 = vld [vmem:[#allocation2 + $0x30] sm:$0xf]  ;;  %v3430_v0 = vcombine.low %v435_v55, %v4823_v59  ;;  %v3424_v1 = vcombine.low %v287_v57, %v4823_v59 }
  0x82   : > { %3812 = vmatprep.subr.bf16.mxu0 %v4246_v44  ;;  %3852 = vmatprep.subr.bf16.mxu1 %v4248_v49  ;;  %v4835_v2 = vcombine.low %v4825_v60, %v4827_v62  ;;  %v3432_v3 = vcombine.low %v4829_v63, %v4829_v63  ;;  %v4839_v4 = vld [vmem:[#allocation2 + $0x30] ss:$0 sps:$4 sm:$0x77]   ;;  %v4266_v44 = vld [vmem:[#allocation6 + $0x190] sm:$0xff]   ;;  %p4509_p5 = pnand %p4508_p0, %p4502_p11 }
  0x83   : > { %v467_v7 = vshrl.u32 %v3430_v0, 16  ;;  %v469_v8 = vshll.u32 %v3430_v0, 16  ;;  %v351_v9 = vshrl.u32 %v3424_v1, 16  ;;  %v353_v10 = vshll.u32 %v3424_v1, 16 }
  0x84   : > { %681 = vmatmul.mubr.bf16.gmra.mxu0 %v490_v52  ;;  %842 = vmatmul.mubr.bf16.gmra.mxu1 %v381_v54  ;;  %v358_v11 = vshll.u32 %v4835_v2, 16  ;;  %v362_v12 = vshrl.u32 %v4835_v2, 16  ;;  %v475_v13 = vshll.u32 %v3432_v3, 16  ;;  %v366_v14 = vshll.u32 %v4839_v4, 16 }
  0x85   : > { %3813 = vmatpush3.bf16.msra.mxu0 %v4247_v48  ;;  %3853 = vmatpush3.bf16.msra.mxu1 %v4249_v50  ;;  %v471_v15 = vrot.slane %v469_v8, 1  ;;  %v355_v16 = vrot.slane %v353_v10, 1  ;;  %v493_v22 = vrot.slane %v3430_v0, 3  ;;  %v494_v26 = vrot.slane %v4835_v2, 3  ;;  %v4268_v48 = vld [vmem:[#allocation6 + $0x148] sm:$0xff]   ;;  %v4294_v8 = vld [vmem:[#allocation6 + $0x258] sm:$0xff]  }
  0x86   : > { %3814 = vmatprep.subr.bf16.mxu0 %v4250_v51  ;;  %3854 = vmatprep.subr.bf16.mxu1 %v4252_v53  ;;  %v360_v19 = vrot.slane %v358_v11, 1  ;;  %v477_v20 = vrot.slane %v475_v13, 1  ;;  %v368_v21 = vrot.slane %v366_v14, 1  ;;  %v384_v27 = vrot.slane %v3424_v1, 2  ;;  %v4273_v13 = vld [vmem:[#allocation6 + $0x100] sm:$0xff]  }
  0x87   : > { %v472_v24 = vor.u32 %v471_v15, %v467_v7  ;;  %v356_v25 = vor.u32 %v355_v16, %v351_v9  ;;  %v385_v29 = vrot.slane %v4835_v2, 2  ;;  %v479_v31 = vshrl.u32 %v3432_v3, 16  ;;  %v4267_v53 = vld [vmem:[#allocation2 + $0x30] ss:$0 sps:$4 sm:$0x33]   ;;  %v4271_v2 = vld [vmem:[#allocation6 + $0x188] sm:$0xff]  }
  0x88   : > { %v364_v28 = vor.u32 %v362_v12, %v360_v19  ;;  %v370_v32 = vshrl.u32 %v4839_v4, 16  ;;  %v495_v0 = vsel %vm482_vm1, %v493_v22, %v494_v26  ;;  %v4272_v9 = vld [vmem:[#allocation6 + $0x140] sm:$0xff]   ;;  %v499_v12 = vrot.slane %v4839_v4, 3  ;;  %v866_v16 = vld [vmem:[#allocation2 + $0x8] sm:$0xf] }
  0x89   : > { %3815 = vmatpush3.bf16.msra.mxu0 %v4251_v56  ;;  %3855 = vmatpush3.bf16.msra.mxu1 %v4258_v58  ;;  %v473_v37 = vsel %vm326_vm0, %v472_v24, %v360_v19  ;;  %v361_v40 = vsel %vm326_vm0, %v356_v25, %v360_v19  ;;  %v481_v56 = vor.u32 %v479_v31, %v477_v20  ;;  %v4269_v58 = vld [vmem:[#allocation6 + $0x108] sm:$0xff]   ;;  %v390_v14 = vrot.slane %v4267_v53, 2  ;;  %v4274_v15 = vld [vmem:[#allocation6 + $0x1c0] sm:$0xff]   ;;  %v4867_v19 = vld [vmem:[#allocation2 + $0x10] sm:$0xff]  }
  0x8a   : > { %3816 = vmatprep.subr.bf16.mxu0 %v4259_v61  ;;  %3856 = vmatprep.subr.bf16.mxu1 %v4261_v6  ;;  %v478_v49 = vsel %vm326_vm0, %v364_v28, %v477_v20  ;;  %v496_v50 = vrot.slane %v473_v37, 3  ;;  %v369_v51 = vsel %vm326_vm0, %v364_v28, %v368_v21  ;;  %v387_v52 = vrot.slane %v361_v40, 2  ;;  %v4270_v61 = vld [vmem:[#allocation6 + $0x1c8] sm:$0xff]   ;;  %v4277_v4 = vld [vmem:[#allocation6 + $0x180] sm:$0xff]   ;;  %v4279_v25 = vld [vmem:[#allocation6 + $0x278] sm:$0xff]  }
  0x8b   : > { %v497_v54 = vrot.slane %v478_v49, 3  ;;  %v388_v55 = vrot.slane %v369_v51, 2  ;;  %v372_v57 = vor.u32 %v370_v32, %v368_v21  ;;  %v386_v1 = vsel %vm373_vm2, %v384_v27, %v385_v29  ;;  %v256_v27 = vld [vmem:[#allocation2 + $0x18] sm:$0x7]  ;;  %v4282_v51 = vld [vmem:[#allocation6 + $0x238] sm:$0xff]  }
  0x8c   : > { %v501_v6 = vrot.slane %v481_v56, 3  ;;  %v500_v20 = vsel %vm482_vm1, %v494_v26, %v499_v12  ;;  %v391_v21 = vsel %vm373_vm2, %v385_v29, %v390_v14  ;;  %v918_v24 = vshll.u32 %v4867_v19, 16 }
  0x8d   : > { %3817 = vmatpush3.bf16.msra.mxu0 %v4260_v5  ;;  %3857 = vmatpush3.bf16.msra.mxu1 %v4262_v17  ;;  %v498_v3 = vsel %vm482_vm1, %v496_v50, %v497_v54  ;;  %v389_v5 = vsel %vm373_vm2, %v387_v52, %v388_v55  ;;  %v392_v7 = vrot.slane %v372_v57, 2  ;;  %v4864_v17 = vld [vmem:[#allocation2 + $0xc] sm:$0xf]  ;;  %v257_v28 = vsel %vm4857_vm5, 0, %v256_v27 }
  0x8e   : > { %3818 = vmatprep.subr.bf16.mxu0 %v4263_v18  ;;  %3858 = vmatprep.subr.bf16.mxu1 %v4265_v23  ;;  %v502_v10 = vsel %vm482_vm1, %v497_v54, %v501_v6  ;;  %v3469_v18 = vcombine.low %v866_v16, %v4864_v17  ;;  %258 = vst [vmem:[#allocation2 + $0x18] sm:$0x7] %v257_v28  ;;  %v4875_v29 = vrot.slane %v918_v24, 1  ;;  %v922_v50 = vshrl.u32 %v4867_v19, 16  ;;  %v4283_v54 = vld [vmem:[#allocation6 + $0x270] sm:$0xff]   ;;  %v4288_v24 = vld [vmem:[#allocation6 + $0x228] sm:$0xff]  }
  0x8f   : > { %688 = vmatprep.mubr.bf16.mxu0 %v498_v3  ;;  %849 = vmatprep.mubr.bf16.mxu1 %v389_v5  ;;  %v393_v11 = vsel %vm373_vm2, %v388_v55, %v392_v7  ;;  %v3465_v49 = vcombine.low %v4770_v41, %v4772_v42  ;;  %v1206_v53 = vrot.slane %v4867_v19, 1  ;;  %v4287_v5 = vld [vmem:[#allocation6 + $0x268] sm:$0xff]   ;;  %v4897_v6 = vld [vmem:[#allocation2 + $0x28] sm:$0xf]  ;;  %v3466_v14 = vcombine.low %v4774_v43, %v4780_v45  ;;  %v4289_v45 = vld [vmem:[#allocation6 + $0x260] sm:$0xff]  }
  0x90   : > { %689 = vmatmul.mubr.bf16.gmra.mxu0 %v495_v0  ;;  %850 = vmatmul.mubr.bf16.gmra.mxu1 %v386_v1  ;;  %v911_v22 = vshrl.u32 %v3469_v18, 16  ;;  %v913_v23 = vshll.u32 %v3469_v18, 16  ;;  %v4284_v0 = vld [vmem:[#allocation6 + $0x230] sm:$0xff]  }
  0x91   : > { %3819 = vmatpush3.bf16.msra.mxu0 %v4264_v30  ;;  %3859 = vmatpush3.bf16.msra.mxu1 %v4266_v44  ;;  %v1156_v30 = vld [vmem:[#allocation2 + $0x8] sm:$0xe] }
  0x92   : > { %3820 = vmatprep.subr.bf16.mxu0 %v4268_v48  ;;  %696 = vmatprep.mubr.bf16.mxu0 %v502_v10  ;;  %v915_v31 = vrot.slane %v913_v23, 1  ;;  %v3491_v26 = vcombine.low %v1156_v30, %v4864_v17 }
  0x93   : > { %857 = vmatprep.mubr.bf16.mxu1 %v393_v11  ;;  %3860 = vmatprep.subr.bf16.mxu1 %v4270_v61  ;;  %v4890_v61 = vor.u32 %v922_v50, %v4875_v29 }
  0x94   : > { %v916_v32 = vor.u32 %v915_v31, %v911_v22  ;;  %v1173_v37 = vshrl.u32 %v3491_v26, 16  ;;  %v1175_v40 = vshll.u32 %v3491_v26, 16  ;;  %v1205_v56 = vrot.slane %v3491_v26, 1 }
  0x95   : > { %3821 = vmatpush3.bf16.msra.mxu0 %v4269_v58  ;;  %3861 = vmatpush3.bf16.msra.mxu1 %v4271_v2  ;;  %v4883_v55 = vld [vmem:[#allocation2 + $0x18] ss:$0 sps:$4 sm:$0x33]   ;;  %v4887_v58 = vld [vmem:[#allocation2 + $0x2c] sm:$0xff]   ;;  %v871_v2 = vld [vmem:[#allocation2 + $0x24] sm:$0xf] }
  0x96   : > { %3822 = vmatprep.subr.bf16.mxu0 %v4272_v9  ;;  %3862 = vmatprep.subr.bf16.mxu1 %v4274_v15  ;;  %v921_v44 = vsel %vm326_vm0, %v916_v32, %v4875_v29  ;;  %v1177_v48 = vrot.slane %v1175_v40, 1  ;;  %v4885_v57 = vld [vmem:[#allocation2 + $0x18] ss:$0 sps:$4 sm:$0x11]   ;;  %v1181_v42 = vshll.u32 %v4883_v55, 16  ;;  %v1185_v1 = vshrl.u32 %v4883_v55, 16 }
  0x97   : > { %v926_v3 = vshll.u32 %v4885_v57, 16  ;;  %v3472_v9 = vcombine.low %v871_v2, %v4897_v6  ;;  %v938_v10 = vshll.u32 %v4887_v58, 16  ;;  %v1207_v12 = vsel %vm1204_vm6, %v1205_v56, %v1206_v53  ;;  %v259_v15 = vld [vmem:[#allocation2 + $0x34] sm:$0x7] }
  0x98   : > { %697 = vmatmul.mubr.bf16.gmra.mxu0 %v500_v20  ;;  %858 = vmatmul.mubr.bf16.gmra.mxu1 %v391_v21  ;;  %v1178_v52 = vor.u32 %v1177_v48, %v1173_v37  ;;  %v1183_v7 = vrot.slane %v1181_v42, 1  ;;  %v1157_v21 = vld [vmem:[#allocation2 + $0x24] sm:$0xe]  ;;  %v260_v27 = vsel %vm4857_vm5, 0, %v259_v15  ;;  %v4290_v37 = vld [vmem:[#allocation6 + $0x220] sm:$0xff]   ;;  %v1216_v50 = vrot.slane %v4887_v58, 1 }
  0x99   : > { %3823 = vmatpush3.bf16.msra.mxu0 %v4273_v13  ;;  %3863 = vmatpush3.bf16.msra.mxu1 %v4277_v4  ;;  %v928_v13 = vrot.slane %v926_v3, 1  ;;  %v931_v20 = vshrl.u32 %v3472_v9, 16  ;;  %v933_v4 = vshll.u32 %v3472_v9, 16  ;;  %v4913_v30 = vrot.slane %v938_v10, 1  ;;  %261 = vst [vmem:[#allocation2 + $0x34] sm:$0x7] %v260_v27 }
  0x9a   : > { %3888 = vmatprep.subr.bf16.mxu0 %v4279_v25  ;;  %1115 = vmatprep.mubr.bf16.mxu0 %v921_v44  ;;  %v1179_v41 = vsel %vm326_vm0, %v1178_v52, %v4875_v29  ;;  %v1184_v16 = vsel %vm326_vm0, %v4890_v61, %v1183_v7  ;;  %v1187_v18 = vor.u32 %v1185_v1, %v1183_v7  ;;  %v1211_v25 = vrot.slane %v4885_v57, 1  ;;  %v4297_v1 = vld [vmem:[#allocation6 + $0x218] sm:$0xff]  }
  0x9b   : > { %v1208_v11 = vrot.slane %v1179_v41, 1  ;;  %v1209_v22 = vrot.slane %v1184_v16, 1  ;;  %v929_v23 = vsel %vm326_vm0, %v4890_v61, %v928_v13  ;;  %v935_v28 = vrot.slane %v933_v4, 1  ;;  %v1435_v41 = vld [vmem:[#allocation2 + $0x8] sm:$0xc] }
  0x9c   : > { %v1213_v43 = vrot.slane %v1187_v18, 1  ;;  %v3492_v31 = vcombine.low %v1157_v21, %v4897_v6  ;;  %v3467_v56 = vcombine.low %v4823_v59, %v4825_v60  ;;  %v1484_v42 = vrot.slane %v4867_v19, 2  ;;  %v4298_v59 = vld [vmem:[#allocation6 + $0x250] sm:$0xff]   ;;  %v1436_v16 = vld [vmem:[#allocation2 + $0x24] sm:$0xc]  ;;  %v4309_v19 = vld [vmem:[#allocation8 + $0xf8] sm:$0xff]  }
  0x9d   : > { %v1210_v26 = vsel %vm1204_vm6, %v1208_v11, %v1209_v22  ;;  %v936_v40 = vor.u32 %v935_v28, %v931_v20  ;;  %v4928_v2 = vcombine.low %v1435_v41, %v4864_v17  ;;  %v1212_v3 = vsel %vm1204_vm6, %v1206_v53, %v1211_v25  ;;  %v4299_v53 = vld [vmem:[#allocation6 + $0x210] sm:$0xff]   ;;  %v4302_v28 = vld [vmem:[#allocation6 + $0x208] sm:$0xff]   ;;  %3928 = vmatprep.subr.bf16.mxu1 %v4309_v19 }
  0x9e   : > { %1394 = vmatprep.mubr.bf16.mxu1 %v1210_v26  ;;  %v1214_v32 = vsel %vm1204_vm6, %v1209_v22, %v1213_v43  ;;  %v1189_v44 = vshrl.u32 %v3492_v31, 16  ;;  %v1191_v48 = vshll.u32 %v3492_v31, 16  ;;  %v3468_v7 = vcombine.low %v4827_v62, %v4829_v63 }
  0x9f   : > { %v1452_v15 = vshrl.u32 %v4928_v2, 16  ;;  %v1454_v62 = vshll.u32 %v4928_v2, 16  ;;  %v1489_v63 = vrot.slane %v4883_v55, 2  ;;  %v1494_v21 = vrot.slane %v4887_v58, 2 }
  0xa0   : > { %1116 = vmatmul.mubr.bf16.vlgmr.msra.gmra.mxu0 %v3465_v49  ;;  %1395 = vmatmul.mubr.bf16.vlgmr.msra.gmra.mxu1 %v1207_v12  ;;  %v942_v49 = vshrl.u32 %v4887_v58, 16  ;;  %v1193_v52 = vrot.slane %v1191_v48, 1  ;;  %v4936_v60 = vld [vmem:[#allocation2 + $0x34] ss:$0 sps:$4 sm:$0x11]   ;;  %v3512_v25 = vcombine.low %v1436_v16, %v4897_v6  ;;  %v4317_v58 = vld [vmem:[#allocation8 + $0xe8] sm:$0xff]  }
  0xa1   : > { %3889 = vmatpush3.bf16.msra.mxu0 %v4282_v51  ;;  %1123 = vmatprep.mubr.bf16.mxu0 %v929_v23  ;;  %v941_v51 = vsel %vm326_vm0, %v936_v40, %v4913_v30  ;;  %v4306_v12 = vld [vmem:[#allocation2 + $0x18] ss:$0 sps:$4 sm:$0x77]   ;;  %v946_v13 = vshll.u32 %v4936_v60, 16 }
  0xa2   : > { %3890 = vmatprep.subr.bf16.mxu0 %v4283_v54  ;;  %1402 = vmatprep.mubr.bf16.mxu1 %v1214_v32  ;;  %v1215_v54 = vrot.slane %v3492_v31, 1  ;;  %v1194_v57 = vor.u32 %v1193_v52, %v1189_v44  ;;  %v1460_v20 = vshll.u32 %v4306_v12, 16  ;;  %v1464_v4 = vshrl.u32 %v4306_v12, 16  ;;  %v4308_v27 = vld [vmem:[#allocation2 + $0x34] ss:$0 sps:$4 sm:$0x77]  }
  0xa3   : > { %v948_v23 = vrot.slane %v946_v13, 1  ;;  %v1221_v31 = vrot.slane %v4936_v60, 1  ;;  %v4303_v40 = vld [vmem:[#allocation6 + $0x240] sm:$0xff]   ;;  %v1468_v44 = vshrl.u32 %v3512_v25, 16 }
  0xa4   : > { %v1195_v9 = vsel %vm326_vm0, %v1194_v57, %v4913_v30  ;;  %v1217_v10 = vsel %vm1204_vm6, %v1215_v54, %v1216_v50  ;;  %v1462_v26 = vrot.slane %v1460_v20, 1  ;;  %v1476_v57 = vshll.u32 %v4308_v27, 16  ;;  %v4310_v20 = vld [vmem:[#allocation8 + $0x78] sm:$0xff]  }
  0xa5   : > { %3891 = vmatpush3.bf16.msra.mxu0 %v4284_v0  ;;  %v4925_v0 = vld [vmem:[#allocation2 + $0x34] ss:$0 sps:$4 sm:$0x33]   ;;  %v1218_v22 = vrot.slane %v1195_v9, 1  ;;  %v1222_v16 = vsel %vm1204_vm6, %v1216_v50, %v1221_v31  ;;  %v4324_v31 = vld [vmem:[#allocation8 + $0x20] sm:$0xff]  }
  0xa6   : > { %3892 = vmatprep.subr.bf16.mxu0 %v4287_v5  ;;  %v4934_v5 = vor.u32 %v942_v49, %v4913_v30  ;;  %v1197_v17 = vshll.u32 %v4925_v0, 16  ;;  %v1201_v11 = vshrl.u32 %v4925_v0, 16  ;;  %v1463_v6 = vsel %vm326_vm0, %v4890_v61, %v1462_v26 }
  0xa7   : > { %v1466_v49 = vor.u32 %v1464_v4, %v1462_v26  ;;  %v1478_v9 = vrot.slane %v1476_v57, 1  ;;  %v4313_v4 = vld [vmem:[#allocation8 + $0xf0] sm:$0xff]   ;;  %v4325_v26 = vld [vmem:[#allocation8 + $0xd8] sm:$0xff]   ;;  %v4338_v57 = vld [vmem:[#allocation8 + $0x40] sm:$0xff]  }
  0xa8   : > { %1124 = vmatmul.mubr.bf16.gmra.mxu0 %v3466_v14  ;;  %v4301_v14 = vld [vmem:[#allocation6 + $0x248] sm:$0xff]   ;;  %1403 = vmatmul.mubr.bf16.gmra.mxu1 %v1212_v3  ;;  %v1199_v18 = vrot.slane %v1197_v17, 1  ;;  %v1493_v17 = vrot.slane %v3512_v25, 2 }
  0xa9   : > { %3893 = vmatpush3.bf16.msra.mxu0 %v4288_v24  ;;  %1131 = vmatprep.mubr.bf16.mxu0 %v941_v51  ;;  %v1456_v24 = vrot.slane %v1454_v62, 1  ;;  %v1470_v51 = vshll.u32 %v3512_v25, 16  ;;  %v1491_v61 = vrot.slane %v1466_v49, 2  ;;  %v1479_v12 = vsel %vm326_vm0, %v4934_v5, %v1478_v9  ;;  %v4318_v25 = vld [vmem:[#allocation8 + $0x68] sm:$0xff]  }
  0xaa   : > { %3894 = vmatprep.subr.bf16.mxu0 %v4289_v45  ;;  %v1200_v43 = vsel %vm326_vm0, %v4934_v5, %v1199_v18  ;;  %v1203_v45 = vor.u32 %v1201_v11, %v1199_v18  ;;  %v1495_v18 = vsel %vm373_vm2, %v1493_v17, %v1494_v21  ;;  %v4333_v49 = vld [vmem:[#allocation8 + $0xc8] sm:$0xff]  }
  0xab   : > { %v1219_v32 = vrot.slane %v1200_v43, 1  ;;  %v1472_v60 = vrot.slane %v1470_v51, 1  ;;  %v4321_v43 = vld [vmem:[#allocation8 + $0xe0] sm:$0xff]   ;;  %v4334_v51 = vld [vmem:[#allocation8 + $0x48] sm:$0xff]  }
  0xac   : > { %v1223_v48 = vrot.slane %v1203_v45, 1  ;;  %v4322_v45 = vld [vmem:[#allocation8 + $0x60] sm:$0xff]  }
  0xad   : > { %3895 = vmatpush3.bf16.msra.mxu0 %v4290_v37  ;;  %v949_v37 = vsel %vm326_vm0, %v4934_v5, %v948_v23  ;;  %v1220_v52 = vsel %vm1204_vm6, %v1218_v22, %v1219_v32  ;;  %v4314_v22 = vld [vmem:[#allocation8 + $0x70] sm:$0xff]  }
  0xae   : > { %3896 = vmatprep.subr.bf16.mxu0 %v4294_v8  ;;  %v1457_v8 = vor.u32 %v1456_v24, %v1452_v15  ;;  %1410 = vmatprep.mubr.bf16.mxu1 %v1220_v52  ;;  %v1224_v41 = vsel %vm1204_vm6, %v1219_v32, %v1223_v48  ;;  %v4315_v23 = vld [vmem:[#allocation8 + $0xb0] sm:$0xff]   ;;  %v4326_v32 = vld [vmem:[#allocation8 + $0x58] sm:$0xff]   ;;  %v4335_v52 = vld [vmem:[#allocation8 + $0x88] sm:$0xff]  }
  0xaf   : > { %v4316_v24 = vld [vmem:[#allocation8 + $0x30] sm:$0xff]  }
  0xb0   : > { %1132 = vmatmul.mubr.bf16.gmra.mxu0 %v3467_v56  ;;  %v1458_v54 = vsel %vm326_vm0, %v1457_v8, %v4875_v29  ;;  %v1487_v56 = vrot.slane %v1463_v6, 2  ;;  %1411 = vmatmul.mubr.bf16.gmra.mxu1 %v1217_v10  ;;  %v1473_v29 = vor.u32 %v1472_v60, %v1468_v44  ;;  %v4329_v8 = vld [vmem:[#allocation8 + $0xd0] sm:$0xff]  }
  0xb1   : > { %3897 = vmatpush3.bf16.msra.mxu0 %v4297_v1  ;;  %1139 = vmatprep.mubr.bf16.mxu0 %v949_v37  ;;  %v4304_v1 = vld [vmem:[#allocation6 + $0x200] sm:$0xff]   ;;  %v1486_v3 = vrot.slane %v1458_v54, 2  ;;  %v4327_v37 = vld [vmem:[#allocation8 + $0x98] sm:$0xff]   ;;  %v4330_v44 = vld [vmem:[#allocation8 + $0x50] sm:$0xff]  }
  0xb2   : > { %3898 = vmatprep.subr.bf16.mxu0 %v4298_v59  ;;  %v1483_v59 = vrot.slane %v4928_v2, 2  ;;  %1418 = vmatprep.mubr.bf16.mxu1 %v1224_v41  ;;  %v1474_v2 = vsel %vm326_vm0, %v1473_v29, %v4913_v30  ;;  %v1492_v5 = vsel %vm373_vm2, %v1487_v56, %v1491_v61  ;;  %v1490_v30 = vsel %vm373_vm2, %v1484_v42, %v1489_v63  ;;  %v4312_v63 = vld [vmem:[#allocation8 + $0x38] sm:$0xff]   ;;  %v4331_v48 = vld [vmem:[#allocation8 + $0x90] sm:$0xff]   ;;  %v4336_v54 = vld [vmem:[#allocation8 + $0x8] sm:$0xff]  }
  0xb3   : > { %v1488_v11 = vsel %vm373_vm2, %v1486_v3, %v1487_v56  ;;  %v1496_v15 = vrot.slane %v1474_v2, 2  ;;  %v4332_v6 = vld [vmem:[#allocation8 + $0x10] sm:$0xff]   ;;  %v4337_v56 = vld [vmem:[#allocation8 + $0xc0] sm:$0xff]   ;;  %v4346_v3 = vld [vmem:[#allocation8 + $0x178] sm:$0xff]  }
  0xb4   : > { %v1485_v10 = vsel %vm373_vm2, %v1483_v59, %v1484_v42  ;;  %v4311_v42 = vld [vmem:[#allocation8 + $0xb8] sm:$0xff]   ;;  %v4339_v41 = vld [vmem:[#allocation8 + $0x80] sm:$0xff]  }
  0xb5   : > { %3899 = vmatpush3.bf16.msra.mxu0 %v4299_v53  ;;  %v1480_v53 = vshrl.u32 %v4308_v27, 16  ;;  %3929 = vmatpush3.bf16.msra.mxu1 %v4311_v42  ;;  %v4320_v27 = vld [vmem:[#allocation8 + $0x28] sm:$0xff]   ;;  %v4347_v59 = vld [vmem:[#allocation8 + $0x1f8] sm:$0xff]  }
  0xb6   : > { %3900 = vmatprep.subr.bf16.mxu0 %v4301_v14  ;;  %v1499_v14 = vrot.slane %v4925_v0, 2  ;;  %3930 = vmatprep.subr.bf16.mxu1 %v4313_v4 }
  0xb7   : > { %v1482_v13 = vor.u32 %v1480_v53, %v1478_v9 }
  0xb8   : > { %1140 = vmatmul.mubr.bf16.gmra.mxu0 %v3468_v7  ;;  %v1497_v7 = vrot.slane %v1479_v12, 2  ;;  %1419 = vmatmul.mubr.bf16.gmra.mxu1 %v1222_v16  ;;  %v1500_v55 = vsel %vm373_vm2, %v1494_v21, %v1499_v14  ;;  %v4319_v21 = vld [vmem:[#allocation8 + $0xa8] sm:$0xff]  }
  0xb9   : > { %3901 = vmatpush3.bf16.msra.mxu0 %v4302_v28  ;;  %1672 = vmatprep.mubr.bf16.mxu0 %v1488_v11  ;;  %v1501_v62 = vrot.slane %v1482_v13, 2  ;;  %v4323_v28 = vld [vmem:[#allocation8 + $0xa0] sm:$0xff]  }
  0xba   : > { %3902 = vmatprep.subr.bf16.mxu0 %v4303_v40  ;;  %v1498_v0 = vsel %vm373_vm2, %v1496_v15, %v1497_v7  ;;  %3931 = vmatpush3.bf16.msra.mxu1 %v4315_v23  ;;  %v4328_v40 = vld [vmem:[#allocation8 + $0x18] sm:$0xff]  }
  0xbb   : > { %v1502_v50 = vsel %vm373_vm2, %v1497_v7, %v1501_v62  ;;  %3932 = vmatprep.subr.bf16.mxu1 %v4317_v58 }
  0xbd   : > { %3903 = vmatpush3.bf16.msra.mxu0 %v4304_v1  ;;  %v4340_v1 = vld [vmem:[#allocation8] sm:$0xff]  }
  0xbe   : > { %3968 = vmatprep.subr.bf16.mxu0 %v4310_v20  ;;  %3933 = vmatpush3.bf16.msra.mxu1 %v4319_v21 }
  0xbf   : > { %3934 = vmatprep.subr.bf16.mxu1 %v4321_v43 }
  0xc0   : > { %1673 = vmatmul.mubr.bf16.vlgmr.msra.gmra.mxu0 %v1485_v10 }
  0xc1   : > { %1680 = vmatprep.mubr.bf16.mxu0 %v1492_v5  ;;  %3969 = vmatpush3.bf16.msra.mxu0 %v4312_v63 }
  0xc2   : > { %3970 = vmatprep.subr.bf16.mxu0 %v4314_v22  ;;  %3935 = vmatpush3.bf16.msra.mxu1 %v4323_v28 }
  0xc3   : > { %3936 = vmatprep.subr.bf16.mxu1 %v4325_v26 }
  0xc5   : > { %3971 = vmatpush3.bf16.msra.mxu0 %v4316_v24 }
  0xc6   : > { %3972 = vmatprep.subr.bf16.mxu0 %v4318_v25  ;;  %3937 = vmatpush3.bf16.msra.mxu1 %v4327_v37 }
  0xc7   : > { %3938 = vmatprep.subr.bf16.mxu1 %v4329_v8 }
  0xc8   : > { %1681 = vmatmul.mubr.bf16.gmra.mxu0 %v1490_v30 }
  0xc9   : > { %1688 = vmatprep.mubr.bf16.mxu0 %v1498_v0  ;;  %3973 = vmatpush3.bf16.msra.mxu0 %v4320_v27 }
  0xca   : > { %3974 = vmatprep.subr.bf16.mxu0 %v4322_v45  ;;  %3939 = vmatpush3.bf16.msra.mxu1 %v4331_v48 }
  0xcb   : > { %3940 = vmatprep.subr.bf16.mxu1 %v4333_v49 }
  0xcd   : > { %3975 = vmatpush3.bf16.msra.mxu0 %v4324_v31 }
  0xce   : > { %3976 = vmatprep.subr.bf16.mxu0 %v4326_v32  ;;  %3941 = vmatpush3.bf16.msra.mxu1 %v4335_v52 }
  0xcf   : > { %3942 = vmatprep.subr.bf16.mxu1 %v4337_v56 }
  0xd0   : > { %1689 = vmatmul.mubr.bf16.gmra.mxu0 %v1495_v18 }
  0xd1   : > { %1696 = vmatprep.mubr.bf16.mxu0 %v1502_v50  ;;  %3977 = vmatpush3.bf16.msra.mxu0 %v4328_v40 }
  0xd2   : > { %3978 = vmatprep.subr.bf16.mxu0 %v4330_v44  ;;  %3943 = vmatpush3.bf16.msra.mxu1 %v4339_v41 }
  0xd3   : > { %4008 = vmatprep.subr.bf16.mxu1 %v4346_v3 }
  0xd5   : > { %3979 = vmatpush3.bf16.msra.mxu0 %v4332_v6 }
  0xd6   : > { %3980 = vmatprep.subr.bf16.mxu0 %v4334_v51 }
  0xd8   : > { %1697 = vmatmul.mubr.bf16.gmra.mxu0 %v1500_v55 }
  0xd9   : > { %3981 = vmatpush3.bf16.msra.mxu0 %v4336_v54 }
  0xda   : > { %3982 = vmatprep.subr.bf16.mxu0 %v4338_v57 }
  0xdd   : > { %3983 = vmatpush3.bf16.msra.mxu0 %v4340_v1 }
  0xde   : > { %4048 = vmatprep.subr.bf16.mxu0 %v4347_v59 }
 0x13c   : > { %v3744_v60 = vpop.f32.mrf.mxu0  ;;  %v3784_v61 = vpop.f32.mrf.mxu1 }
 0x13e   : > { %v3745_v9 = vpop.f32.mrf.mxu0  ;;  %v3785_v17 = vpop.f32.mrf.mxu1 }
 0x13f   : > { %v3746_v1 = vadd.f32 %v3745_v9, %v3744_v60  ;;  %v3786_v3 = vadd.f32 %v3785_v17, %v3784_v61 }
 0x140   : > { %v3747_v53 = vpop.f32.mrf.mxu0  ;;  %v3787_v11 = vpop.f32.mrf.mxu1 }
 0x141   : > { %v836_v38 = vadd.f32 %v3786_v3, %v3746_v1 }
 0x142   : > { %v3748_v29 = vpop.f32.mrf.mxu0  ;;  %v3788_v12 = vpop.f32.mrf.mxu1 }
 0x143   : > { %v3749_v36 = vadd.f32 %v3748_v29, %v3747_v53  ;;  %v3789_v35 = vadd.f32 %v3788_v12, %v3787_v11 }
 0x144   : > { %v3750_v13 = vpop.f32.mrf.mxu0  ;;  %v3790_v2 = vpop.f32.mrf.mxu1 }
 0x145   : > { %v839_v60 = vadd.f32 %v3789_v35, %v3749_v36 }
 0x146   : > { %v3751_v7 = vpop.f32.mrf.mxu0  ;;  %v3791_v14 = vpop.f32.mrf.mxu1 }
 0x148   : > { %v4991_v15 = vpop.f32.mrf.mxu0  ;;  %v4993_v62 = vpop.f32.mrf.mxu1 }
 0x14a   : > { %v4995_v10 = vpop.f32.mrf.mxu0  ;;  %v4997_v16 = vpop.f32.mrf.mxu1 }
 0x14b   : > { %v3755_v53 = vadd.f32 %v4995_v10, %v4991_v15 }
 0x150   : > { %v4999_v5 = vpop.f32.mrf.mxu0  ;;  %v5001_v30 = vpop.f32.mrf.mxu1 }
 0x152   : > { %v5003_v0 = vpop.f32.mrf.mxu0  ;;  %v5005_v18 = vpop.f32.mrf.mxu1 }
 0x153   : > { %v3798_v10 = vadd.f32 %v5005_v18, %v5001_v30 }
 0x154   : > { %v5007_v50 = vpop.f32.mrf.mxu0  ;;  %v5009_v55 = vpop.f32.mrf.mxu1 }
 0x156   : > { %v5011_v19 = vpop.f32.mrf.mxu0  ;;  %v5013_v20 = vpop.f32.mrf.mxu1 }
 0x157   : > { %v3761_v30 = vadd.f32 %v5011_v19, %v5007_v50  ;;  %v3801_v18 = vadd.f32 %v5013_v20, %v5009_v55 }
 0x158   : > { %v5015_v42 = vpop.f32.mrf.mxu0  ;;  %v5019_v4 = vpop.f32.mrf.mxu1 }
 0x159   : > { %v855_v19 = vadd.f32 %v3801_v18, %v3761_v30  ;;  %v1793_v30 = vld [vmem:[#allocation2 + $0x4] sm:$0xc] }
 0x15a   : > { %v5017_v63 = vpop.f32.mrf.mxu0  ;;  %v5025_v24 = vpop.f32.mrf.mxu1 }
 0x15b   : > { %5537 = vst [vmem:[#allocation23_spill] sm:$0xff] %v5025_v24  ;;  %v3792_v24 = vadd.f32 %v3791_v14, %v3790_v2  ;;  %v3764_v55 = vadd.f32 %v5017_v63, %v5015_v42 }
 0x15c   : > { %v5021_v22 = vpop.f32.mrf.mxu0  ;;  %v5027_v21 = vpop.f32.mrf.mxu1 }
 0x15d   : > { %5535 = vst [vmem:[#allocation21_spill] sm:$0xff] %v5021_v22  ;;  %5538 = vst [vmem:[#allocation24_spill] sm:$0xff] %v5027_v21  ;;  %v3752_v22 = vadd.f32 %v3751_v7, %v3750_v13 }
 0x15e   : > { %v5023_v23 = vpop.f32.mrf.mxu0  ;;  %v5029_v45 = vpop.f32.mrf.mxu1 }
 0x15f   : > { %5536 = vst [vmem:[#allocation22_spill] sm:$0xff] %v5023_v23  ;;  %5539 = vst [vmem:[#allocation25_spill] sm:$0xff] %v5029_v45  ;;  %v844_v1 = vadd.f32 %v3792_v24, %v3752_v22 }
 0x160   : > { %v3824_v58 = vpop.f32.mrf.mxu0  ;;  %v3864_v31 = vpop.f32.mrf.mxu1 }
 0x162   : > { %v3825_v25 = vpop.f32.mrf.mxu0  ;;  %v3865_v32 = vpop.f32.mrf.mxu1  ;;  %v5543_v20 = vld [vmem:[#allocation23_spill] sm:$0xff] }
 0x163   : > { %v3826_v47 = vadd.f32 %v3825_v25, %v3824_v58  ;;  %v3866_v45 = vadd.f32 %v3865_v32, %v3864_v31  ;;  %v3804_v3 = vadd.f32 %v5543_v20, %v5019_v4 }
 0x164   : > { %v3827_v27 = vpop.f32.mrf.mxu0  ;;  %v3867_v40 = vpop.f32.mrf.mxu1 }
 0x165   : > { %v1148_v33 = vadd.f32 %v3826_v47, %v836_v38  ;;  %v3795_v38 = vadd.f32 %v4997_v16, %v4993_v62  ;;  %v5050_v47 = vld [vmem:[%s5501_s3] ss:$0 sm:$0xff]  ;;  %v3758_v62 = vadd.f32 %v5003_v0, %v4999_v5  ;;  %v860_v63 = vadd.f32 %v3804_v3, %v3764_v55 }
 0x166   : > { %v3828_v43 = vpop.f32.mrf.mxu0  ;;  %v3868_v44 = vpop.f32.mrf.mxu1  ;;  %v5547_v4 = vld [vmem:[#allocation22_spill] sm:$0xff] }
 0x167   : > { %v3829_v21 = vadd.f32 %v3828_v43, %v3827_v27  ;;  %v1427_v17 = vadd.f32 %v3866_v45, %v1148_v33  ;;  %v3869_v25 = vadd.f32 %v3868_v44, %v3867_v40  ;;  %v847_v15 = vadd.f32 %v3795_v38, %v3755_v53 }
 0x168   : > { %v3830_v28 = vpop.f32.mrf.mxu0  ;;  %v3870_v6 = vpop.f32.mrf.mxu1 }
 0x169   : > { %v1149_v58 = vadd.f32 %v3829_v21, %v839_v60 }
 0x16a   : > { %v3831_v26 = vpop.f32.mrf.mxu0  ;;  %v3871_v51 = vpop.f32.mrf.mxu1 }
 0x16b   : > { %v3832_v61 = vadd.f32 %v3831_v26, %v3830_v28  ;;  %v1428_v12 = vadd.f32 %v3869_v25, %v1149_v58  ;;  %v3872_v13 = vadd.f32 %v3871_v51, %v3870_v6  ;;  %v852_v26 = vadd.f32 %v3798_v10, %v3758_v62 }
 0x16c   : > { %v3833_v37 = vpop.f32.mrf.mxu0  ;;  %v3873_v54 = vpop.f32.mrf.mxu1 }
 0x16d   : > { %v1150_v11 = vadd.f32 %v3832_v61, %v844_v1 }
 0x16e   : > { %v3834_v8 = vpop.f32.mrf.mxu0  ;;  %v3874_v57 = vpop.f32.mrf.mxu1 }
 0x16f   : > { %v3835_v33 = vadd.f32 %v3834_v8, %v3833_v37  ;;  %v3875_v21 = vadd.f32 %v3874_v57, %v3873_v54  ;;  %v1429_v45 = vadd.f32 %v3872_v13, %v1150_v11  ;;  %v5548_v11 = vld [vmem:[#allocation24_spill] sm:$0xff] }
 0x170   : > { %v3836_v48 = vpop.f32.mrf.mxu0  ;;  %v3876_v46 = vpop.f32.mrf.mxu1 }
 0x171   : > { %v1151_v24 = vadd.f32 %v3835_v33, %v847_v15  ;;  %v5549_v33 = vld [vmem:[#allocation25_spill] sm:$0xff] }
 0x172   : > { %v3837_v49 = vpop.f32.mrf.mxu0  ;;  %v3877_v23 = vpop.f32.mrf.mxu1 }
 0x173   : > { %v3838_v27 = vadd.f32 %v3837_v49, %v3836_v48  ;;  %v1430_v8 = vadd.f32 %v3875_v21, %v1151_v24  ;;  %v3878_v48 = vadd.f32 %v3877_v23, %v3876_v46 }
 0x174   : > { %v5031_v52 = vpop.f32.mrf.mxu0 }
 0x175   : > { %v1152_v44 = vadd.f32 %v3838_v27, %v852_v26 }
 0x176   : > { %v5033_v56 = vpop.f32.mrf.mxu0 }
 0x177   : > { %v3841_v6 = vadd.f32 %v5033_v56, %v5031_v52  ;;  %v1431_v25 = vadd.f32 %v3878_v48, %v1152_v44 }
 0x178   : > { %v5035_v41 = vpop.f32.mrf.mxu0 }
 0x179   : > { %5540 = vst [vmem:[#allocation26_spill] sm:$0xff] %v5035_v41  ;;  %v1153_v23 = vadd.f32 %v3841_v6, %v855_v19 }
 0x17a   : > { %v5037_v59 = vpop.f32.mrf.mxu0 }
 0x17b   : > { %5541 = vst [vmem:[#allocation27_spill] sm:$0xff] %v5037_v59  ;;  %v3879_v59 = vpop.f32.mrf.mxu1 }
 0x17c   : > { %v5039_v39 = vpop.f32.mrf.mxu0 }
 0x17d   : > { %5542 = vst [vmem:[#allocation28_spill] sm:$0xff] %v5039_v39  ;;  %v3880_v2 = vpop.f32.mrf.mxu1 }
 0x17e   : > { %v5041_v34 = vpop.f32.mrf.mxu0 }
 0x17f   : > { %v3882_v28 = vpop.f32.mrf.mxu1 }
 0x180   : > { %v3904_v41 = vpop.f32.mrf.mxu0  ;;  %v5544_v52 = vld [vmem:[#allocation26_spill] sm:$0xff] }
 0x181   : > { %v3883_v51 = vpop.f32.mrf.mxu1 }
 0x182   : > { %v3905_v9 = vpop.f32.mrf.mxu0  ;;  %v5545_v56 = vld [vmem:[#allocation27_spill] sm:$0xff] }
 0x183   : > { %v3906_v39 = vadd.f32 %v3905_v9, %v3904_v41  ;;  %v3881_v9 = vadd.f32 %v3880_v2, %v3879_v59  ;;  %v3885_v1 = vpop.f32.mrf.mxu1 }
 0x184   : > { %v3907_v35 = vpop.f32.mrf.mxu0  ;;  %v5550_v15 = vld [vmem:[#allocation28_spill] sm:$0xff] }
 0x185   : > { %v1705_v36 = vadd.f32 %v3906_v39, %v1427_v17  ;;  %v5060_v39 = vld [vmem:[%s5501_s3 + $0x1] ss:$0 sm:$0xff]  ;;  %v3844_v17 = vadd.f32 %v5545_v56, %v5544_v52  ;;  %v1432_v2 = vadd.f32 %v3881_v9, %v1153_v23  ;;  %v3847_v62 = vadd.f32 %v5041_v34, %v5550_v15 }
 0x186   : > { %v3908_v29 = vpop.f32.mrf.mxu0 }
 0x187   : > { %v1717_v7 = vmul.f32 %v5050_v47, %v1705_v36  ;;  %v3909_v14 = vadd.f32 %v3908_v29, %v3907_v35  ;;  %v5546_v35 = vld [vmem:[#allocation21_spill] sm:$0xff]  ;;  %v3807_v29 = vadd.f32 %v5549_v33, %v5548_v11 }
 0x188   : > { %v3910_v16 = vpop.f32.mrf.mxu0  ;;  %v3767_v36 = vadd.f32 %v5547_v4, %v5546_v35 }
 0x189   : > { %v1706_v22 = vadd.f32 %v3909_v14, %v1428_v12  ;;  %v1729_v31 = vadd.f32 %v5060_v39, %v1717_v7  ;;  %v1154_v7 = vadd.f32 %v3844_v17, %v860_v63  ;;  %v3884_v14 = vadd.f32 %v3883_v51, %v3882_v28 }
 0x18a   : > { %v3911_v43 = vpop.f32.mrf.mxu0 }
 0x18b   : > { %v1718_v5 = vmul.f32 %v5050_v47, %v1706_v22  ;;  %v3912_v0 = vadd.f32 %v3911_v43, %v3910_v16  ;;  %v1737_v54 = vmax.f32 %v1729_v31, 0.0  ;;  %v3886_v16 = vpop.f32.mrf.mxu1  ;;  %v863_v43 = vadd.f32 %v3807_v29, %v3767_v36  ;;  %v1943_v31 = vld [vmem:[#allocation2 + $0x4] sm:$0x8] }
 0x18c   : > { %v3913_v32 = vpop.f32.mrf.mxu0  ;;  %v1433_v18 = vadd.f32 %v3884_v14, %v1154_v7 }
 0x18d   : > { %v1730_v37 = vadd.f32 %v5060_v39, %v1718_v5  ;;  %v1707_v40 = vadd.f32 %v3912_v0, %v1429_v45  ;;  %v1155_v28 = vadd.f32 %v3847_v62, %v863_v43 }
 0x18e   : > { %v3914_v49 = vpop.f32.mrf.mxu0 }
 0x18f   : > { %v1738_v57 = vmax.f32 %v1730_v37, 0.0  ;;  %v1719_v41 = vmul.f32 %v5050_v47, %v1707_v40  ;;  %v3915_v50 = vadd.f32 %v3914_v49, %v3913_v32  ;;  %v3887_v32 = vadd.f32 %v3886_v16, %v3885_v1 }
 0x190   : > { %v3916_v60 = vpop.f32.mrf.mxu0 }
 0x191   : > { %v3690_v61 = vpack.c.bf16 %v1738_v57, %v1737_v54  ;;  %v1708_v46 = vadd.f32 %v3915_v50, %v1430_v8  ;;  %v1731_v53 = vadd.f32 %v5060_v39, %v1719_v41  ;;  %v1434_v55 = vadd.f32 %v3887_v32, %v1155_v28 }
 0x192   : > { %v3917_v58 = vpop.f32.mrf.mxu0 }
 0x193   : > { %3722 = vst [vmem:[#allocation2 + $0x8] sm:$0xff] %v3690_v61   ;;  %v1720_v38 = vmul.f32 %v5050_v47, %v1708_v46  ;;  %v3918_v42 = vadd.f32 %v3917_v58, %v3916_v60  ;;  %v1739_v22 = vmax.f32 %v1731_v53, 0.0 }
 0x194   : > { %v3919_v59 = vpop.f32.mrf.mxu0 }
 0x195   : > { %v1732_v12 = vadd.f32 %v5060_v39, %v1720_v38  ;;  %v1709_v13 = vadd.f32 %v3918_v42, %v1431_v25 }
 0x196   : > { %v3920_v10 = vpop.f32.mrf.mxu0 }
 0x197   : > { %v1740_v24 = vmax.f32 %v1732_v12, 0.0  ;;  %v1721_v21 = vmul.f32 %v5050_v47, %v1709_v13  ;;  %v3921_v27 = vadd.f32 %v3920_v10, %v3919_v59 }
 0x198   : > { %v3922_v45 = vpop.f32.mrf.mxu0 }
 0x199   : > { %v3695_v5 = vpack.c.bf16 %v1740_v24, %v1739_v22  ;;  %v1733_v0 = vadd.f32 %v5060_v39, %v1721_v21  ;;  %v1710_v26 = vadd.f32 %v3921_v27, %v1432_v2  ;;  %v1944_v22 = vld [vmem:[#allocation2 + $0x20] sm:$0x8] }
 0x19a   : > { %v3923_v37 = vpop.f32.mrf.mxu0  ;;  %v5089_v34 = vld [vmem:[#allocation2 + $0x8] sm:$0xf]  ;;  %v5103_v23 = vld [vmem:[#allocation2 + $0xc] sm:$0xf] }
 0x19b   : > { %3723 = vst [vmem:[#allocation2 + $0x10] sm:$0xff] %v3695_v5   ;;  %v1741_v40 = vmax.f32 %v1733_v0, 0.0  ;;  %v1722_v8 = vmul.f32 %v5050_v47, %v1710_v26  ;;  %v3924_v44 = vadd.f32 %v3923_v37, %v3922_v45  ;;  %v5093_v48 = vcombine.low %v1943_v31, %v5089_v34  ;;  %v1798_v31 = vld [vmem:[#allocation2 + $0x20] sm:$0xc] }
 0x19c   : > { %v3925_v6 = vpop.f32.mrf.mxu0  ;;  %v5096_v49 = vcombine.low %v1793_v30, %v5089_v34 }
 0x19d   : > { %v3673_v51 = vpack.c.bf16 %v1741_v40, %v1741_v40  ;;  %v1734_v54 = vadd.f32 %v5060_v39, %v1722_v8  ;;  %v1711_v57 = vadd.f32 %v3924_v44, %v1433_v18  ;;  %v1962_v50 = vshll.u32 %v5093_v48, 16  ;;  %v4348_v44 = vld [vmem:[#allocation8 + $0x138] sm:$0xff]  }
 0x19e   : > { %v3926_v41 = vpop.f32.mrf.mxu0  ;;  %v1840_v19 = vshll.u32 %v5096_v49, 16  ;;  %v1960_v42 = vshrl.u32 %v5093_v48, 16  ;;  %v1838_v36 = vshrl.u32 %v5096_v49, 16  ;;  %v1991_v24 = vrot.slane %v5093_v48, 3 }
 0x19f   : > { %1781 = vst [vmem:[#allocation2 + $0x24] sm:$0xf] %v3673_v51  ;;  %v1723_v20 = vmul.f32 %v5050_v47, %v1711_v57  ;;  %v3927_v3 = vadd.f32 %v3926_v41, %v3925_v6  ;;  %v1742_v60 = vmax.f32 %v1734_v54, 0.0  ;;  %v1964_v9 = vrot.slane %v1962_v50, 1  ;;  %v4349_v50 = vld [vmem:[#allocation8 + $0x1b8] sm:$0xff]  }
 0x1a0   : > { %v1842_v52 = vrot.slane %v1840_v19, 1  ;;  %v1883_v8 = vrot.slane %v5096_v49, 2 }
 0x1a1   : > { %v1735_v61 = vadd.f32 %v5060_v39, %v1723_v20  ;;  %v1712_v46 = vadd.f32 %v3927_v3, %v1434_v55  ;;  %v1965_v11 = vor.u32 %v1964_v9, %v1960_v42  ;;  %v4350_v20 = vld [vmem:[#allocation8 + $0x170] sm:$0xff]  }
 0x1a2   : > { %v5105_v56 = vld [vmem:[#allocation2 + $0x10] sm:$0xf]  ;;  %v5107_v17 = vld [vmem:[#allocation2 + $0x14] sm:$0xf]  ;;  %v1843_v13 = vor.u32 %v1842_v52, %v1838_v36  ;;  %v4351_v3 = vld [vmem:[#allocation8 + $0x1f0] sm:$0xff]  }
 0x1a3   : > { %v1743_v58 = vmax.f32 %v1735_v61, 0.0  ;;  %v1724_v25 = vmul.f32 %v5050_v47, %v1712_v46  ;;  %v5112_v1 = vcombine.low %v5103_v23, %v5105_v56  ;;  %v3551_v53 = vcombine.low %v5107_v17, %v5107_v17  ;;  %v5116_v38 = vld [vmem:[#allocation2 + $0x14] ss:$0 sps:$4 sm:$0x77]   ;;  %v4356_v36 = vld [vmem:[#allocation8 + $0x1e8] sm:$0xff]  }
 0x1a4   : > { %v1853_v33 = vshll.u32 %v5116_v38, 16  ;;  %v1857_v15 = vshrl.u32 %v5116_v38, 16  ;;  %v5134_v18 = vld [vmem:[#allocation2 + $0x14] ss:$0 sps:$4 sm:$0x33]  }
 0x1a5   : > { %v3700_v63 = vpack.c.bf16 %v1743_v58, %v1742_v60  ;;  %v1736_v35 = vadd.f32 %v5060_v39, %v1724_v25  ;;  %v1845_v4 = vshll.u32 %v5112_v1, 16  ;;  %v1968_v47 = vshll.u32 %v3551_v53, 16  ;;  %v4352_v58 = vld [vmem:[#allocation8 + $0x130] sm:$0xff]  }
 0x1a6   : > { %v1849_v12 = vshrl.u32 %v5112_v1, 16  ;;  %v1855_v7 = vrot.slane %v1853_v33, 1  ;;  %v1972_v14 = vshrl.u32 %v3551_v53, 16  ;;  %v1992_v21 = vrot.slane %v5112_v1, 3  ;;  %v5129_v45 = vld [vmem:[#allocation2 + $0x24] sm:$0xf] }
 0x1a7   : > { %3724 = vst [vmem:[#allocation2 + $0x28] sm:$0xff] %v3700_v63   ;;  %v1744_v29 = vmax.f32 %v1736_v35, 0.0  ;;  %v1847_v59 = vrot.slane %v1845_v4, 1  ;;  %v1970_v2 = vrot.slane %v1968_v47, 1  ;;  %v1884_v30 = vrot.slane %v5112_v1, 2  ;;  %v4353_v25 = vld [vmem:[#allocation8 + $0x1b0] sm:$0xff]  }
 0x1a8   : > { %v1859_v43 = vor.u32 %v1857_v15, %v1855_v7  ;;  %v5138_v48 = vcombine.low %v1944_v22, %v5129_v45  ;;  %v5141_v6 = vcombine.low %v1798_v31, %v5129_v45  ;;  %v1993_v57 = vsel %vm482_vm1, %v1991_v24, %v1992_v21  ;;  %v5165_v63 = vld [vmem:[#allocation2 + $0xc] sm:$0xf]  ;;  %v5169_v35 = vld [vmem:[#allocation2 + $0x18] ss:$0 sps:$4 sm:$0x33]   ;;  %v4355_v4 = vld [vmem:[#allocation8 + $0x168] sm:$0xff]  }
 0x1a9   : > { %v3676_v39 = vpack.c.bf16 %v1744_v29, %v1744_v29  ;;  %v1851_v62 = vor.u32 %v1849_v12, %v1847_v59  ;;  %v1966_v10 = vsel %vm326_vm0, %v1965_v11, %v1847_v59  ;;  %v1848_v16 = vsel %vm326_vm0, %v1843_v13, %v1847_v59  ;;  %v2664_v59 = vld [vmem:[#allocation2 + $0x8] sm:$0xe] }
 0x1aa   : > { %v1974_v27 = vor.u32 %v1972_v14, %v1970_v2  ;;  %v1994_v0 = vrot.slane %v1966_v10, 3  ;;  %v1886_v32 = vrot.slane %v1848_v16, 2  ;;  %v1891_v41 = vrot.slane %v1859_v43, 2  ;;  %v2374_v31 = vld [vmem:[#allocation2 + $0x8] sm:$0xf] }
 0x1ab   : > { %1784 = vst [vmem:[#allocation2 + $0x30] sm:$0xf] %v3676_v39  ;;  %v1971_v5 = vsel %vm326_vm0, %v1851_v62, %v1970_v2  ;;  %v1856_v26 = vsel %vm326_vm0, %v1851_v62, %v1855_v7  ;;  %v1885_v55 = vsel %vm373_vm2, %v1883_v8, %v1884_v30  ;;  %v1997_v60 = vrot.slane %v5116_v38, 3  ;;  %v5167_v38 = vld [vmem:[#allocation2 + $0x10] sm:$0xff]  }
 0x1ac   : > { %v1995_v28 = vrot.slane %v1971_v5, 3  ;;  %v1887_v37 = vrot.slane %v1856_v26, 2  ;;  %v1999_v40 = vrot.slane %v1974_v27, 3  ;;  %v1978_v46 = vshll.u32 %v5138_v48, 16  ;;  %v4358_v26 = vld [vmem:[#allocation8 + $0x1a8] sm:$0xff]  }
 0x1ad   : > { %v1889_v53 = vrot.slane %v5134_v18, 2  ;;  %v1863_v42 = vshll.u32 %v5141_v6, 16  ;;  %v1976_v47 = vshrl.u32 %v5138_v48, 16  ;;  %v1861_v29 = vshrl.u32 %v5141_v6, 16 }
 0x1ae   : > { %v1996_v51 = vsel %vm482_vm1, %v1994_v0, %v1995_v28  ;;  %v1888_v54 = vsel %vm373_vm2, %v1886_v32, %v1887_v37  ;;  %v5148_v19 = vld [vmem:[#allocation2 + $0x28] sm:$0xf]  ;;  %v5150_v49 = vld [vmem:[#allocation2 + $0x2c] sm:$0xf]  ;;  %v2000_v9 = vsel %vm482_vm1, %v1995_v28, %v1999_v40  ;;  %v1892_v52 = vsel %vm373_vm2, %v1887_v37, %v1891_v41  ;;  %v4357_v0 = vld [vmem:[#allocation8 + $0x128] sm:$0xff]  }
 0x1af   : > { %2180 = vmatprep.mubr.bf16.mxu1 %v1996_v51  ;;  %2341 = vmatprep.mubr.bf16.mxu0 %v1888_v54  ;;  %v5158_v61 = vcombine.low %v5148_v19, %v5150_v49  ;;  %v1980_v33 = vrot.slane %v1978_v46, 1  ;;  %v1865_v2 = vrot.slane %v1863_v42, 1  ;;  %v2426_v10 = vshll.u32 %v5167_v38, 16  ;;  %v4360_v37 = vld [vmem:[#allocation8 + $0x1e0] sm:$0xff]   ;;  %v4369_v42 = vld [vmem:[#allocation8 + $0x1d8] sm:$0xff]  }
 0x1b0   : > { %2181 = vmatmul.mubr.bf16.vlgmr.msra.gmra.mxu1 %v1993_v57  ;;  %2342 = vmatmul.mubr.bf16.vlgmr.msra.gmra.mxu0 %v1885_v55  ;;  %v5183_v16 = vcombine.low %v2664_v59, %v5165_v63  ;;  %v1998_v22 = vsel %vm482_vm1, %v1992_v21, %v1997_v60  ;;  %v1890_v5 = vsel %vm373_vm2, %v1884_v30, %v1889_v53  ;;  %v2689_v32 = vshll.u32 %v5169_v35, 16  ;;  %v4359_v21 = vld [vmem:[#allocation8 + $0x160] sm:$0xff]   ;;  %v4368_v53 = vld [vmem:[#allocation8 + $0x158] sm:$0xff]  }
 0x1b1   : > { %2188 = vmatprep.mubr.bf16.mxu1 %v2000_v9  ;;  %2349 = vmatprep.mubr.bf16.mxu0 %v1892_v52  ;;  %v1868_v11 = vshll.u32 %v5158_v61, 16  ;;  %v1872_v12 = vshrl.u32 %v5158_v61, 16  ;;  %v1981_v39 = vor.u32 %v1980_v33, %v1976_v47  ;;  %v1866_v62 = vor.u32 %v1865_v2, %v1861_v29  ;;  %v4366_v9 = vld [vmem:[#allocation8 + $0x120] sm:$0xff]  }
 0x1b2   : > { %4009 = vmatpush3.bf16.msra.mxu1 %v4348_v44  ;;  %4049 = vmatpush3.bf16.msra.mxu0 %v4349_v50  ;;  %v5175_v13 = vld [vmem:[#allocation2 + $0x30] sm:$0xf]  ;;  %v5197_v1 = vcombine.low %v2374_v31, %v5165_v63  ;;  %v5199_v30 = vrot.slane %v2426_v10, 1  ;;  %v2683_v54 = vshll.u32 %v5183_v16, 16  ;;  %v4367_v52 = vld [vmem:[#allocation8 + $0x1a0] sm:$0xff]   ;;  %v2001_v59 = vrot.slane %v5138_v48, 3 }
 0x1b3   : > { %4010 = vmatprep.subr.bf16.mxu1 %v4350_v20  ;;  %4050 = vmatprep.subr.bf16.mxu0 %v4351_v3  ;;  %v1870_v7 = vrot.slane %v1868_v11, 1  ;;  %v3552_v14 = vcombine.low %v5175_v13, %v5175_v13  ;;  %v5179_v15 = vld [vmem:[#allocation2 + $0x30] ss:$0 sps:$4 sm:$0x77]  }
 0x1b4   : > { %v1876_v43 = vshll.u32 %v5179_v15, 16  ;;  %v1880_v51 = vshrl.u32 %v5179_v15, 16 }
 0x1b5   : > { %v1874_v24 = vor.u32 %v1872_v12, %v1870_v7  ;;  %v1984_v27 = vshll.u32 %v3552_v14, 16  ;;  %v1982_v18 = vsel %vm326_vm0, %v1981_v39, %v1870_v7  ;;  %v1871_v28 = vsel %vm326_vm0, %v1866_v62, %v1870_v7  ;;  %v4371_v39 = vld [vmem:[#allocation8 + $0x198] sm:$0xff]  }
 0x1b6   : > { %4011 = vmatpush3.bf16.msra.mxu1 %v4352_v58  ;;  %4051 = vmatpush3.bf16.msra.mxu0 %v4353_v25  ;;  %v1878_v8 = vrot.slane %v1876_v43, 1  ;;  %v1988_v44 = vshrl.u32 %v3552_v14, 16  ;;  %v2004_v20 = vrot.slane %v1982_v18, 3  ;;  %v1896_v60 = vrot.slane %v1871_v28, 2  ;;  %v4370_v14 = vld [vmem:[#allocation8 + $0x118] sm:$0xff]   ;;  %v4374_v18 = vld [vmem:[#allocation8 + $0x110] sm:$0xff]  }
 0x1b7   : > { %4012 = vmatprep.subr.bf16.mxu1 %v4355_v4  ;;  %4052 = vmatprep.subr.bf16.mxu0 %v4356_v36  ;;  %v1986_v40 = vrot.slane %v1984_v27, 1  ;;  %v2002_v58 = vrot.slane %v5158_v61, 3  ;;  %v1894_v25 = vrot.slane %v5158_v61, 2  ;;  %v2430_v4 = vshrl.u32 %v5167_v38, 16  ;;  %v4375_v28 = vld [vmem:[#allocation8 + $0x190] sm:$0xff]  }
 0x1b8   : > { %2189 = vmatmul.mubr.bf16.gmra.mxu1 %v1998_v22  ;;  %2350 = vmatmul.mubr.bf16.gmra.mxu0 %v1890_v5  ;;  %v1879_v41 = vsel %vm326_vm0, %v1874_v24, %v1878_v8  ;;  %v1882_v55 = vor.u32 %v1880_v51, %v1878_v8  ;;  %v5207_v36 = vrot.slane %v2689_v32, 1  ;;  %v1893_v12 = vrot.slane %v5141_v6, 2  ;;  %v4372_v6 = vld [vmem:[#allocation8 + $0x150] sm:$0xff]   ;;  %v4377_v8 = vld [vmem:[#allocation8 + $0x148] sm:$0xff]  }
 0x1b9   : > { %v1987_v57 = vsel %vm326_vm0, %v1874_v24, %v1986_v40  ;;  %v1990_v50 = vor.u32 %v1988_v44, %v1986_v40  ;;  %v1897_v46 = vrot.slane %v1879_v41, 2  ;;  %v5214_v2 = vor.u32 %v2430_v4, %v5199_v30  ;;  %v4373_v22 = vld [vmem:[#allocation8 + $0x1d0] sm:$0xff]   ;;  %v4376_v24 = vld [vmem:[#allocation2 + $0x30] ss:$0 sps:$4 sm:$0x33]   ;;  %v4378_v44 = vld [vmem:[#allocation8 + $0x1c8] sm:$0xff]  }
 0x1ba   : > { %4013 = vmatpush3.bf16.msra.mxu1 %v4357_v0  ;;  %4053 = vmatpush3.bf16.msra.mxu0 %v4358_v26  ;;  %v2005_v3 = vrot.slane %v1987_v57, 3  ;;  %v1901_v29 = vrot.slane %v1882_v55, 2  ;;  %v2685_v7 = vrot.slane %v2683_v54, 1  ;;  %v2421_v62 = vshll.u32 %v5197_v1, 16  ;;  %v5231_v26 = vld [vmem:[#allocation2 + $0x28] sm:$0xf] }
 0x1bb   : > { %4014 = vmatprep.subr.bf16.mxu1 %v4359_v21  ;;  %4054 = vmatprep.subr.bf16.mxu0 %v4360_v37  ;;  %v1898_v47 = vsel %vm373_vm2, %v1896_v60, %v1897_v46  ;;  %v2009_v33 = vrot.slane %v1990_v50, 3  ;;  %v2003_v10 = vsel %vm482_vm1, %v2001_v59, %v2002_v58  ;;  %v1895_v48 = vsel %vm373_vm2, %v1893_v12, %v1894_v25  ;;  %v5233_v21 = vld [vmem:[#allocation2 + $0x2c] sm:$0xff]   ;;  %v2665_v54 = vld [vmem:[#allocation2 + $0x24] sm:$0xe]  ;;  %v4388_v59 = vld [vmem:[#allocation8 + $0x100] sm:$0xff]  }
 0x1bc   : > { %v2006_v11 = vsel %vm482_vm1, %v2004_v20, %v2005_v3  ;;  %2357 = vmatprep.mubr.bf16.mxu0 %v1898_v47  ;;  %v2681_v27 = vshrl.u32 %v5183_v16, 16  ;;  %v1902_v31 = vsel %vm373_vm2, %v1897_v46, %v1901_v29  ;;  %v5229_v0 = vsel %vm326_vm0, %v5214_v2, %v5207_v36  ;;  %v4379_v55 = vld [vmem:[#allocation8 + $0x108] sm:$0xff]   ;;  %v5253_v4 = vld [vmem:[#allocation2 + $0x18] ss:$0 sps:$4 sm:$0x11]  }
 0x1bd   : > { %2196 = vmatprep.mubr.bf16.mxu1 %v2006_v11  ;;  %v2010_v43 = vsel %vm482_vm1, %v2005_v3, %v2009_v33  ;;  %v2423_v32 = vrot.slane %v2421_v62, 1  ;;  %v2007_v37 = vrot.slane %v5179_v15, 3  ;;  %v1899_v40 = vrot.slane %v4376_v24, 2  ;;  %v4384_v3 = vld [vmem:[#allocation8 + $0x188] sm:$0xff]   ;;  %v4389_v12 = vld [vmem:[#allocation8 + $0x180] sm:$0xff]  }
 0x1be   : > { %4015 = vmatpush3.bf16.msra.mxu1 %v4366_v9  ;;  %4055 = vmatpush3.bf16.msra.mxu0 %v4367_v52  ;;  %v2686_v5 = vor.u32 %v2685_v7, %v2681_v27  ;;  %v2419_v57 = vshrl.u32 %v5197_v1, 16  ;;  %v2716_v41 = vrot.slane %v5229_v0, 1  ;;  %v5241_v50 = vcombine.low %v2665_v54, %v5231_v26  ;;  %v5245_v9 = vld [vmem:[#allocation2 + $0x34] ss:$0 sps:$4 sm:$0x33]   ;;  %v4397_v54 = vld [vmem:[#allocation8 + $0x268] sm:$0xff]  }
 0x1bf   : > { %4016 = vmatprep.subr.bf16.mxu1 %v4368_v53  ;;  %4056 = vmatprep.subr.bf16.mxu0 %v4369_v42  ;;  %v2693_v20 = vshrl.u32 %v5169_v35, 16  ;;  %v2446_v46 = vshll.u32 %v5233_v21, 16  ;;  %v2008_v1 = vsel %vm482_vm1, %v2002_v58, %v2007_v37  ;;  %v1900_v52 = vsel %vm373_vm2, %v1894_v25, %v1899_v40  ;;  %v4386_v53 = vld [vmem:[#allocation8 + $0x140] sm:$0xff]   ;;  %v2379_v33 = vld [vmem:[#allocation2 + $0x24] sm:$0xf]  ;;  %v4393_v0 = vld [vmem:[#allocation8 + $0x238] sm:$0xff]  }
 0x1c0   : > { %2197 = vmatmul.mubr.bf16.gmra.mxu1 %v2003_v10  ;;  %2358 = vmatmul.mubr.bf16.gmra.mxu0 %v1895_v48  ;;  %v2687_v51 = vsel %vm326_vm0, %v2686_v5, %v5199_v30  ;;  %v2424_v15 = vor.u32 %v2423_v32, %v2419_v57  ;;  %v4387_v42 = vld [vmem:[#allocation8 + $0x1c0] sm:$0xff]   ;;  %v2699_v58 = vshll.u32 %v5241_v50, 16  ;;  %v2434_v61 = vshll.u32 %v5253_v4, 16 }
 0x1c1   : > { %2204 = vmatprep.mubr.bf16.mxu1 %v2010_v43  ;;  %2365 = vmatprep.mubr.bf16.mxu0 %v1902_v31  ;;  %v2715_v60 = vrot.slane %v2687_v51, 1  ;;  %v2695_v25 = vor.u32 %v2693_v20, %v5207_v36  ;;  %v3592_v29 = vcombine.low %v2379_v33, %v5231_v26  ;;  %v5262_v7 = vrot.slane %v2446_v46, 1  ;;  %v4405_v33 = vld [vmem:[#allocation8 + $0x220] sm:$0xff]  }
 0x1c2   : > { %4017 = vmatpush3.bf16.msra.mxu1 %v4370_v14  ;;  %4057 = vmatpush3.bf16.msra.mxu0 %v4371_v39  ;;  %v2429_v11 = vsel %vm326_vm0, %v2424_v15, %v5199_v30  ;;  %v2705_v14 = vshll.u32 %v5245_v9, 16  ;;  %v4391_v39 = vld [vmem:[#allocation8 + $0x278] sm:$0xff]   ;;  %v2713_v62 = vrot.slane %v5167_v38, 1  ;;  %v2450_v10 = vshrl.u32 %v5233_v21, 16 }
 0x1c3   : > { %4018 = vmatprep.subr.bf16.mxu1 %v4372_v6  ;;  %4058 = vmatprep.subr.bf16.mxu0 %v4373_v22  ;;  %v2717_v47 = vsel %vm1204_vm6, %v2715_v60, %v2716_v41  ;;  %v2701_v48 = vrot.slane %v2699_v58, 1  ;;  %v2436_v6 = vrot.slane %v2434_v61, 1  ;;  %v2720_v36 = vrot.slane %v2695_v25, 1  ;;  %v4407_v61 = vld [vmem:[#allocation8 + $0x258] sm:$0xff]  }
 0x1c4   : > { %v2441_v22 = vshll.u32 %v3592_v29, 16  ;;  %v2712_v24 = vrot.slane %v5183_v16, 1  ;;  %v5269_v27 = vor.u32 %v2450_v10, %v5262_v7  ;;  %v2697_v43 = vshrl.u32 %v5241_v50, 16 }
 0x1c5   : > { %v2707_v31 = vrot.slane %v2705_v14, 1  ;;  %v3585_v5 = vcombine.low %v5089_v34, %v5103_v23  ;;  %v2437_v16 = vsel %vm326_vm0, %v5214_v2, %v2436_v6  ;;  %v2721_v37 = vsel %vm1204_vm6, %v2716_v41, %v2720_v36  ;;  %v2942_v34 = vld [vmem:[#allocation2 + $0x8] sm:$0xc] }
 0x1c6   : > { %4019 = vmatpush3.bf16.msra.mxu1 %v4374_v18  ;;  %4059 = vmatpush3.bf16.msra.mxu0 %v4375_v28  ;;  %v2714_v18 = vsel %vm1204_vm6, %v2712_v24, %v2713_v62  ;;  %v4394_v28 = vld [vmem:[#allocation8 + $0x270] sm:$0xff]   ;;  %v2702_v32 = vor.u32 %v2701_v48, %v2697_v43  ;;  %v2443_v40 = vrot.slane %v2441_v22, 1  ;;  %v2718_v51 = vrot.slane %v5253_v4, 1  ;;  %v2943_v24 = vld [vmem:[#allocation2 + $0x24] sm:$0xc] }
 0x1c7   : > { %4020 = vmatprep.subr.bf16.mxu1 %v4377_v8  ;;  %4060 = vmatprep.subr.bf16.mxu0 %v4378_v44  ;;  %v2708_v8 = vsel %vm326_vm0, %v5269_v27, %v2707_v31  ;;  %v4395_v23 = vld [vmem:[#allocation8 + $0x230] sm:$0xff]   ;;  %v2439_v44 = vshrl.u32 %v3592_v29, 16  ;;  %v2709_v41 = vshrl.u32 %v5245_v9, 16  ;;  %v5285_v15 = vcombine.low %v2942_v34, %v5165_v63 }
 0x1c8   : > { %2205 = vmatmul.mubr.bf16.gmra.mxu1 %v2008_v1  ;;  %2366 = vmatmul.mubr.bf16.gmra.mxu0 %v1900_v52  ;;  %v2703_v57 = vsel %vm326_vm0, %v2702_v32, %v5262_v7  ;;  %v2726_v20 = vrot.slane %v2708_v8, 1  ;;  %v3586_v60 = vcombine.low %v5105_v56, %v5107_v17  ;;  %v4403_v1 = vld [vmem:[#allocation8 + $0x228] sm:$0xff]   ;;  %v4408_v52 = vld [vmem:[#allocation2 + $0x34] ss:$0 sps:$4 sm:$0x11]   ;;  %v2723_v58 = vrot.slane %v5233_v21, 1 }
 0x1c9   : > { %2623 = vmatprep.mubr.bf16.mxu1 %v2429_v11  ;;  %2901 = vmatprep.mubr.bf16.mxu0 %v2717_v47  ;;  %v2725_v46 = vrot.slane %v2703_v57, 1  ;;  %v2454_v11 = vshll.u32 %v4408_v52, 16  ;;  %v2711_v47 = vor.u32 %v2709_v41, %v2707_v31  ;;  %v2961_v56 = vshll.u32 %v5285_v15, 16  ;;  %v4410_v48 = vld [vmem:[#allocation8 + $0x250] sm:$0xff]   ;;  %v4413_v31 = vld [vmem:[#allocation8 + $0x248] sm:$0xff]   ;;  %v4416_v8 = vld [vmem:[#allocation8 + $0x240] sm:$0xff]  }
 0x1ca   : > { %4021 = vmatpush3.bf16.msra.mxu1 %v4379_v55  ;;  %4061 = vmatpush3.bf16.msra.mxu0 %v4384_v3  ;;  %v2444_v55 = vor.u32 %v2443_v40, %v2439_v44  ;;  %v5287_v3 = vld [vmem:[#allocation2 + $0x18] ss:$0 sps:$4 sm:$0x77]   ;;  %v2959_v6 = vshrl.u32 %v5285_v15, 16  ;;  %v2728_v43 = vrot.slane %v4408_v52, 1  ;;  %v3588_v32 = vcombine.low %v5150_v49, %v5175_v13 }
 0x1cb   : > { %4022 = vmatprep.subr.bf16.mxu1 %v4386_v53  ;;  %4062 = vmatprep.subr.bf16.mxu0 %v4387_v42  ;;  %v2719_v53 = vsel %vm1204_vm6, %v2713_v62, %v2718_v51  ;;  %v4404_v42 = vld [vmem:[#allocation8 + $0x260] sm:$0xff]   ;;  %v2727_v63 = vsel %vm1204_vm6, %v2725_v46, %v2726_v20  ;;  %v2967_v17 = vshll.u32 %v5287_v3, 16  ;;  %v2456_v25 = vrot.slane %v2454_v11, 1  ;;  %v4409_v62 = vld [vmem:[#allocation8 + $0x218] sm:$0xff]  }
 0x1cc   : > { %v2449_v4 = vsel %vm326_vm0, %v2444_v55, %v5262_v7  ;;  %v2730_v29 = vrot.slane %v2711_v47, 1  ;;  %v2729_v40 = vsel %vm1204_vm6, %v2723_v58, %v2728_v43  ;;  %v2991_v49 = vrot.slane %v5167_v38, 2 }
 0x1cd   : > { %v2969_v14 = vrot.slane %v2967_v17, 1  ;;  %v2457_v36 = vsel %vm326_vm0, %v5269_v27, %v2456_v25  ;;  %v2996_v46 = vrot.slane %v5169_v35, 2 }
 0x1ce   : > { %4023 = vmatpush3.bf16.msra.mxu1 %v4388_v59  ;;  %4063 = vmatpush3.bf16.msra.mxu0 %v4389_v12  ;;  %v2722_v59 = vrot.slane %v5241_v50, 1  ;;  %v2963_v12 = vrot.slane %v2961_v56, 1  ;;  %v2731_v50 = vsel %vm1204_vm6, %v2726_v20, %v2730_v29 }
 0x1cf   : > { %4088 = vmatprep.subr.bf16.mxu1 %v4391_v39  ;;  %v3587_v39 = vcombine.low %v5129_v45, %v5148_v19  ;;  %v2970_v45 = vsel %vm326_vm0, %v5214_v2, %v2969_v14  ;;  %v4411_v19 = vld [vmem:[#allocation8 + $0x210] sm:$0xff]  }
 0x1d0   : > { %v2724_v10 = vsel %vm1204_vm6, %v2722_v59, %v2723_v58  ;;  %v2964_v22 = vor.u32 %v2963_v12, %v2959_v6 }
 0x1d1   : > { %2624 = vmatmul.mubr.bf16.vlgmr.msra.gmra.mxu1 %v3585_v5  ;;  %2902 = vmatmul.mubr.bf16.vlgmr.msra.gmra.mxu0 %v2714_v18  ;;  %v2994_v18 = vrot.slane %v2970_v45, 2 }
 0x1d2   : > { %2631 = vmatprep.mubr.bf16.mxu1 %v2437_v16  ;;  %2909 = vmatprep.mubr.bf16.mxu0 %v2721_v37  ;;  %v2965_v5 = vsel %vm326_vm0, %v2964_v22, %v5199_v30  ;;  %v4414_v16 = vld [vmem:[#allocation8 + $0x208] sm:$0xff]   ;;  %v4418_v37 = vld [vmem:[#allocation2 + $0x34] ss:$0 sps:$4 sm:$0x77]  }
 0x1d3   : > { %4089 = vmatpush3.bf16.msra.mxu1 %v4393_v0  ;;  %v3632_v0 = vcombine.low %v2943_v24, %v5231_v26  ;;  %v2993_v2 = vrot.slane %v2965_v5, 2  ;;  %v2983_v44 = vshll.u32 %v4418_v37, 16  ;;  %v2987_v52 = vshrl.u32 %v4418_v37, 16 }
 0x1d4   : > { %4090 = vmatprep.subr.bf16.mxu1 %v4394_v28  ;;  %v2971_v28 = vshrl.u32 %v5287_v3, 16 }
 0x1d5   : > { %v2995_v30 = vsel %vm373_vm2, %v2993_v2, %v2994_v18  ;;  %v2977_v34 = vshll.u32 %v3632_v0, 16  ;;  %v2975_v57 = vshrl.u32 %v3632_v0, 16  ;;  %v2985_v55 = vrot.slane %v2983_v44, 1 }
 0x1d6   : > { %v2973_v26 = vor.u32 %v2971_v28, %v2969_v14  ;;  %v3000_v47 = vrot.slane %v3632_v0, 2 }
 0x1d7   : > { %4091 = vmatpush3.bf16.msra.mxu1 %v4395_v23  ;;  %v4417_v23 = vld [vmem:[#allocation8 + $0x200] sm:$0xff]   ;;  %v2979_v13 = vrot.slane %v2977_v34, 1 }
 0x1d8   : > { %4092 = vmatprep.subr.bf16.mxu1 %v4397_v54  ;;  %v2998_v51 = vrot.slane %v2973_v26, 2  ;;  %v2990_v54 = vrot.slane %v5285_v15, 2 }
 0x1d9   : > { %2632 = vmatmul.mubr.bf16.gmra.mxu1 %v3586_v60  ;;  %2910 = vmatmul.mubr.bf16.gmra.mxu0 %v2719_v53  ;;  %v2980_v41 = vor.u32 %v2979_v13, %v2975_v57  ;;  %v2986_v60 = vsel %vm326_vm0, %v5269_v27, %v2985_v55  ;;  %v2997_v53 = vsel %vm373_vm2, %v2991_v49, %v2996_v46 }
 0x1da   : > { %2639 = vmatprep.mubr.bf16.mxu1 %v2449_v4  ;;  %2917 = vmatprep.mubr.bf16.mxu0 %v2727_v63  ;;  %v2992_v20 = vsel %vm373_vm2, %v2990_v54, %v2991_v49  ;;  %v2999_v3 = vsel %vm373_vm2, %v2994_v18, %v2998_v51  ;;  %v2989_v4 = vor.u32 %v2987_v52, %v2985_v55  ;;  %v3001_v63 = vrot.slane %v5233_v21, 2 }
 0x1db   : > { %4093 = vmatpush3.bf16.msra.mxu1 %v4403_v1  ;;  %v2981_v38 = vsel %vm326_vm0, %v2980_v41, %v5262_v7  ;;  %v3004_v1 = vrot.slane %v2986_v60, 2  ;;  %v3006_v7 = vrot.slane %v5245_v9, 2 }
 0x1dc   : > { %4094 = vmatprep.subr.bf16.mxu1 %v4404_v42  ;;  %v3003_v15 = vrot.slane %v2981_v38, 2  ;;  %v3008_v11 = vrot.slane %v2989_v4, 2  ;;  %v3002_v27 = vsel %vm373_vm2, %v3000_v47, %v3001_v63 }
 0x1dd   : > { %v3007_v56 = vsel %vm373_vm2, %v3001_v63, %v3006_v7 }
 0x1de   : > { %v3005_v42 = vsel %vm373_vm2, %v3003_v15, %v3004_v1  ;;  %v3009_v35 = vsel %vm373_vm2, %v3004_v1, %v3008_v11 }
 0x1df   : > { %4095 = vmatpush3.bf16.msra.mxu1 %v4405_v33 }
 0x1e0   : > { %4096 = vmatprep.subr.bf16.mxu1 %v4407_v61 }
 0x1e1   : > { %2640 = vmatmul.mubr.bf16.gmra.mxu1 %v3587_v39  ;;  %2918 = vmatmul.mubr.bf16.gmra.mxu0 %v2724_v10 }
 0x1e2   : > { %2647 = vmatprep.mubr.bf16.mxu1 %v2457_v36  ;;  %2925 = vmatprep.mubr.bf16.mxu0 %v2731_v50 }
 0x1e3   : > { %4097 = vmatpush3.bf16.msra.mxu1 %v4409_v62 }
 0x1e4   : > { %4098 = vmatprep.subr.bf16.mxu1 %v4410_v48 }
 0x1e7   : > { %4099 = vmatpush3.bf16.msra.mxu1 %v4411_v19 }
 0x1e8   : > { %4100 = vmatprep.subr.bf16.mxu1 %v4413_v31 }
 0x1e9   : > { %2648 = vmatmul.mubr.bf16.gmra.mxu1 %v3588_v32  ;;  %2926 = vmatmul.mubr.bf16.gmra.mxu0 %v2729_v40 }
 0x1ea   : > { %3179 = vmatprep.mubr.bf16.mxu1 %v2995_v30 }
 0x1eb   : > { %4101 = vmatpush3.bf16.msra.mxu1 %v4414_v16 }
 0x1ec   : > { %4102 = vmatprep.subr.bf16.mxu1 %v4416_v8 }
 0x1ef   : > { %4103 = vmatpush3.bf16.msra.mxu1 %v4417_v23 }
 0x1f2   : > { %3180 = vmatmul.mubr.bf16.vlgmr.msra.gmra.mxu1 %v2992_v20 }
 0x1f3   : > { %3187 = vmatprep.mubr.bf16.mxu1 %v2999_v3 }
 0x1fa   : > { %3188 = vmatmul.mubr.bf16.gmra.mxu1 %v2997_v53 }
 0x1fb   : > { %3195 = vmatprep.mubr.bf16.mxu1 %v3005_v42 }
 0x202   : > { %3196 = vmatmul.mubr.bf16.gmra.mxu1 %v3002_v27 }
 0x203   : > { %3203 = vmatprep.mubr.bf16.mxu1 %v3009_v35 }
 0x20a   : > { %3204 = vmatmul.mubr.bf16.gmra.mxu1 %v3007_v56 }
 0x270   : > { %v3944_v17 = vpop.f32.mrf.mxu1  ;;  %v3984_v33 = vpop.f32.mrf.mxu0 }
 0x272   : > { %v3945_v58 = vpop.f32.mrf.mxu1  ;;  %v3985_v61 = vpop.f32.mrf.mxu0 }
 0x273   : > { %v3946_v52 = vadd.f32 %v3945_v58, %v3944_v17  ;;  %v3986_v15 = vadd.f32 %v3985_v61, %v3984_v33 }
 0x274   : > { %v3947_v25 = vpop.f32.mrf.mxu1  ;;  %v3987_v29 = vpop.f32.mrf.mxu0 }
 0x275   : > { %v2344_v11 = vadd.f32 %v3986_v15, %v3946_v52  ;;  %v5558_v52 = vld [vmem:[#allocation14_spill] sm:$0xff] }
 0x276   : > { %v3948_v21 = vpop.f32.mrf.mxu1  ;;  %v3988_v59 = vpop.f32.mrf.mxu0  ;;  %v1786_v15 = vunpack.c.l.bf16 %v5558_v52 }
 0x277   : > { %v3949_v47 = vadd.f32 %v3948_v21, %v3947_v25  ;;  %v3989_v27 = vadd.f32 %v3988_v59, %v3987_v29  ;;  %v5387_v21 = vld [vmem:[%s5501_s3 + $0x2] ss:$0 sm:$0xff] }
 0x278   : > { %v3950_v12 = vpop.f32.mrf.mxu1  ;;  %v3990_v14 = vpop.f32.mrf.mxu0 }
 0x27a   : > { %v3951_v39 = vpop.f32.mrf.mxu1  ;;  %v3991_v62 = vpop.f32.mrf.mxu0 }
 0x27b   : > { %v3992_v17 = vadd.f32 %v3991_v62, %v3990_v14 }
 0x27c   : > { %v5332_v10 = vpop.f32.mrf.mxu1  ;;  %v5334_v48 = vpop.f32.mrf.mxu0 }
 0x27e   : > { %v3954_v9 = vpop.f32.mrf.mxu1  ;;  %v3994_v6 = vpop.f32.mrf.mxu0 }
 0x27f   : > { %v3955_v25 = vadd.f32 %v3954_v9, %v5332_v10  ;;  %v3995_v29 = vadd.f32 %v3994_v6, %v5334_v48 }
 0x280   : > { %v5336_v36 = vpop.f32.mrf.mxu1  ;;  %v5338_v50 = vpop.f32.mrf.mxu0 }
 0x282   : > { %v5340_v22 = vpop.f32.mrf.mxu1  ;;  %v5342_v45 = vpop.f32.mrf.mxu0 }
 0x284   : > { %v5344_v19 = vpop.f32.mrf.mxu1  ;;  %v5346_v24 = vpop.f32.mrf.mxu0 }
 0x286   : > { %v5348_v43 = vpop.f32.mrf.mxu1  ;;  %v5350_v31 = vpop.f32.mrf.mxu0 }
 0x288   : > { %v5352_v5 = vpop.f32.mrf.mxu1  ;;  %v5354_v0 = vpop.f32.mrf.mxu0 }
 0x28a   : > { %v5356_v18 = vpop.f32.mrf.mxu1  ;;  %v5358_v28 = vpop.f32.mrf.mxu0 }
 0x28c   : > { %v5360_v32 = vpop.f32.mrf.mxu1  ;;  %v5362_v16 = vpop.f32.mrf.mxu0 }
 0x28d   : > { %5551 = vst [vmem:[#allocation23_spill] sm:$0xff] %v5360_v32  ;;  %5552 = vst [vmem:[#allocation26_spill] sm:$0xff] %v5362_v16  ;;  %v3952_v32 = vadd.f32 %v3951_v39, %v3950_v12 }
 0x28e   : > { %v5364_v2 = vpop.f32.mrf.mxu1  ;;  %v5366_v37 = vpop.f32.mrf.mxu0 }
 0x28f   : > { %5553 = vst [vmem:[#allocation27_spill] sm:$0xff] %v5364_v2  ;;  %5554 = vst [vmem:[#allocation21_spill] sm:$0xff] %v5366_v37  ;;  %v2347_v2 = vadd.f32 %v3989_v27, %v3949_v47 }
 0x291   : > { %v4024_v40 = vpop.f32.mrf.mxu1  ;;  %v4064_v8 = vpop.f32.mrf.mxu0 }
 0x293   : > { %v4025_v30 = vpop.f32.mrf.mxu1  ;;  %v4065_v34 = vpop.f32.mrf.mxu0 }
 0x294   : > { %v4026_v4 = vadd.f32 %v4025_v30, %v4024_v40  ;;  %v4066_v33 = vadd.f32 %v4065_v34, %v4064_v8  ;;  %v3958_v8 = vadd.f32 %v5340_v22, %v5336_v36  ;;  %v3961_v22 = vadd.f32 %v5348_v43, %v5344_v19 }
 0x295   : > { %v4027_v26 = vpop.f32.mrf.mxu1  ;;  %v4067_v44 = vpop.f32.mrf.mxu0 }
 0x296   : > { %v2656_v56 = vadd.f32 %v4026_v4, %v2344_v11 }
 0x297   : > { %v4028_v23 = vpop.f32.mrf.mxu1  ;;  %v4068_v51 = vpop.f32.mrf.mxu0 }
 0x298   : > { %v4029_v37 = vadd.f32 %v4028_v23, %v4027_v26  ;;  %v2352_v26 = vadd.f32 %v3992_v17, %v3952_v32  ;;  %v4069_v12 = vadd.f32 %v4068_v51, %v4067_v44  ;;  %v5557_v32 = vld [vmem:[#allocation13_spill] sm:$0xff]  ;;  %v3998_v44 = vadd.f32 %v5342_v45, %v5338_v50 }
 0x299   : > { %v4030_v49 = vpop.f32.mrf.mxu1  ;;  %v4070_v55 = vpop.f32.mrf.mxu0  ;;  %v1785_v34 = vunpack.c.l.bf16 %v5557_v32  ;;  %v4001_v50 = vadd.f32 %v5350_v31, %v5346_v24  ;;  %v5565_v32 = vld [vmem:[#allocation21_spill] sm:$0xff] }
 0x29a   : > { %v2657_v40 = vadd.f32 %v4029_v37, %v2347_v2  ;;  %v5392_v2 = vld [vmem:[%s5501_s3 + $0x3] ss:$0 sm:$0xff]  ;;  %v2355_v37 = vadd.f32 %v3995_v29, %v3955_v25 }
 0x29b   : > { %v4031_v13 = vpop.f32.mrf.mxu1  ;;  %v4071_v3 = vpop.f32.mrf.mxu0  ;;  %v2363_v31 = vadd.f32 %v4001_v50, %v3961_v22  ;;  %v5567_v22 = vld [vmem:[#allocation17_spill] sm:$0xff] }
 0x29c   : > { %v4032_v30 = vadd.f32 %v4031_v13, %v4030_v49  ;;  %v2935_v10 = vadd.f32 %v4069_v12, %v2657_v40  ;;  %v4072_v49 = vadd.f32 %v4071_v3, %v4070_v55  ;;  %v2360_v3 = vadd.f32 %v3998_v44, %v3958_v8  ;;  %v5564_v8 = vld [vmem:[#allocation26_spill] sm:$0xff] }
 0x29d   : > { %v4033_v54 = vpop.f32.mrf.mxu1  ;;  %v4073_v38 = vpop.f32.mrf.mxu0  ;;  %v1789_v50 = vunpack.c.l.bf16 %v5567_v22 }
 0x29e   : > { %v2658_v9 = vadd.f32 %v4032_v30, %v2352_v26 }
 0x29f   : > { %v4034_v57 = vpop.f32.mrf.mxu1  ;;  %v4074_v42 = vpop.f32.mrf.mxu0 }
 0x2a0   : > { %v4035_v39 = vadd.f32 %v4034_v57, %v4033_v54  ;;  %v2936_v4 = vadd.f32 %v4072_v49, %v2658_v9  ;;  %v4075_v45 = vadd.f32 %v4074_v42, %v4073_v38  ;;  %v3964_v38 = vadd.f32 %v5356_v18, %v5352_v5 }
 0x2a1   : > { %v4036_v20 = vpop.f32.mrf.mxu1  ;;  %v5380_v7 = vpop.f32.mrf.mxu0  ;;  %v4004_v42 = vadd.f32 %v5358_v28, %v5354_v0 }
 0x2a2   : > { %v2659_v54 = vadd.f32 %v4035_v39, %v2355_v37 }
 0x2a3   : > { %v4037_v41 = vpop.f32.mrf.mxu1  ;;  %v4077_v58 = vpop.f32.mrf.mxu0 }
 0x2a4   : > { %v2937_v17 = vadd.f32 %v4075_v45, %v2659_v54  ;;  %v4078_v25 = vadd.f32 %v4077_v58, %v5380_v7  ;;  %v2368_v7 = vadd.f32 %v4004_v42, %v3964_v38  ;;  %v5562_v58 = vld [vmem:[#allocation23_spill] sm:$0xff] }
 0x2a5   : > { %v5368_v60 = vpop.f32.mrf.mxu1  ;;  %v4079_v62 = vpop.f32.mrf.mxu0 }
 0x2a7   : > { %v5370_v46 = vpop.f32.mrf.mxu1  ;;  %v4080_v57 = vpop.f32.mrf.mxu0 }
 0x2a9   : > { %v5372_v1 = vpop.f32.mrf.mxu1 }
 0x2ab   : > { %v5374_v53 = vpop.f32.mrf.mxu1 }
 0x2ac   : > { %5555 = vst [vmem:[#allocation22_spill] sm:$0xff] %v5374_v53  ;;  %v2934_v53 = vadd.f32 %v4066_v33, %v2656_v56  ;;  %v5559_v33 = vld [vmem:[#allocation15_spill] sm:$0xff] }
 0x2ad   : > { %v5376_v63 = vpop.f32.mrf.mxu1 }
 0x2ae   : > { %5556 = vst [vmem:[#allocation24_spill] sm:$0xff] %v5376_v63 }
 0x2af   : > { %v5378_v35 = vpop.f32.mrf.mxu1 }
 0x2b2   : > { %v4104_v16 = vpop.f32.mrf.mxu1 }
 0x2b4   : > { %v4105_v61 = vpop.f32.mrf.mxu1 }
 0x2b5   : > { %v4106_v63 = vadd.f32 %v4105_v61, %v4104_v16  ;;  %v1787_v61 = vunpack.c.l.bf16 %v5559_v33 }
 0x2b6   : > { %v4107_v59 = vpop.f32.mrf.mxu1 }
 0x2b7   : > { %v3212_v14 = vadd.f32 %v4106_v63, %v2934_v53  ;;  %v4038_v63 = vadd.f32 %v4037_v41, %v4036_v20  ;;  %v4041_v20 = vadd.f32 %v5370_v46, %v5368_v60  ;;  %v4082_v41 = vpop.f32.mrf.mxu0 }
 0x2b8   : > { %v4108_v16 = vpop.f32.mrf.mxu1 }
 0x2b9   : > { %v3224_v48 = vmul.f32 %v5387_v21, %v3212_v14  ;;  %v4109_v6 = vadd.f32 %v4108_v16, %v4107_v59  ;;  %v2660_v30 = vadd.f32 %v4038_v63, %v2360_v3  ;;  %v2661_v12 = vadd.f32 %v4041_v20, %v2363_v31  ;;  %v5560_v14 = vld [vmem:[#allocation22_spill] sm:$0xff]  ;;  %v4083_v16 = vpop.f32.mrf.mxu0 }
 0x2ba   : > { %v4110_v23 = vpop.f32.mrf.mxu1  ;;  %v4044_v39 = vadd.f32 %v5560_v14, %v5372_v1  ;;  %v5568_v20 = vld [vmem:[#allocation18_spill] sm:$0xff] }
 0x2bb   : > { %v3236_v13 = vadd.f32 %v5392_v2, %v3224_v48  ;;  %v3213_v51 = vadd.f32 %v4109_v6, %v2935_v10  ;;  %v5561_v10 = vld [vmem:[#allocation16_spill] sm:$0xff]  ;;  %v2938_v18 = vadd.f32 %v4078_v25, %v2660_v30  ;;  %v5563_v6 = vld [vmem:[#allocation27_spill] sm:$0xff]  ;;  %v4085_v52 = vpop.f32.mrf.mxu0  ;;  %v1790_v33 = vunpack.c.l.bf16 %v5568_v20 }
 0x2bc   : > { %v4111_v53 = vpop.f32.mrf.mxu1  ;;  %v1788_v9 = vunpack.c.l.bf16 %v5561_v10  ;;  %v3967_v37 = vadd.f32 %v5563_v6, %v5562_v58  ;;  %v2662_v54 = vadd.f32 %v4044_v39, %v2368_v7 }
 0x2bd   : > { %v3225_v11 = vmul.f32 %v5387_v21, %v3213_v51  ;;  %v4112_v36 = vadd.f32 %v4111_v53, %v4110_v23  ;;  %v3244_v47 = vadd.f32 %v3236_v13, %v1785_v34  ;;  %v4007_v34 = vadd.f32 %v5565_v32, %v5564_v8  ;;  %v5566_v53 = vld [vmem:[#allocation24_spill] sm:$0xff] }
 0x2be   : > { %v4113_v55 = vpop.f32.mrf.mxu1  ;;  %v4081_v23 = vadd.f32 %v4080_v57, %v4079_v62 }
 0x2bf   : > { %v3237_v27 = vadd.f32 %v5392_v2, %v3225_v11  ;;  %v3214_v56 = vadd.f32 %v4112_v36, %v2936_v4  ;;  %v3252_v60 = vmax.f32 %v3244_v47, 0.0  ;;  %v4047_v4 = vadd.f32 %v5378_v35, %v5566_v53 }
 0x2c0   : > { %v4114_v40 = vpop.f32.mrf.mxu1  ;;  %v2939_v51 = vadd.f32 %v4081_v23, %v2661_v12  ;;  %v2371_v11 = vadd.f32 %v4007_v34, %v3967_v37  ;;  %v4084_v36 = vadd.f32 %v4083_v16, %v4082_v41 }
 0x2c1   : > { %v3245_v19 = vadd.f32 %v3237_v27, %v1786_v15  ;;  %v3226_v43 = vmul.f32 %v5387_v21, %v3214_v56  ;;  %v4115_v24 = vadd.f32 %v4114_v40, %v4113_v55 }
 0x2c2   : > { %v4116_v29 = vpop.f32.mrf.mxu1  ;;  %v2940_v56 = vadd.f32 %v4084_v36, %v2662_v54 }
 0x2c3   : > { %v3253_v46 = vmax.f32 %v3245_v19, 0.0  ;;  %v3238_v59 = vadd.f32 %v5392_v2, %v3226_v43  ;;  %v3215_v26 = vadd.f32 %v4115_v24, %v2937_v17  ;;  %v4086_v17 = vpop.f32.mrf.mxu0 }
 0x2c4   : > { %v4117_v5 = vpop.f32.mrf.mxu1  ;;  %v4087_v43 = vadd.f32 %v4086_v17, %v4085_v52 }
 0x2c5   : > { %v3705_v48 = vpack.c.bf16 %v3253_v46, %v3252_v60  ;;  %v3227_v0 = vmul.f32 %v5387_v21, %v3215_v26  ;;  %v4118_v28 = vadd.f32 %v4117_v5, %v4116_v29  ;;  %v3246_v1 = vadd.f32 %v3238_v59, %v1787_v61  ;;  %v5569_v59 = vld [vmem:[#allocation19_spill] sm:$0xff] }
 0x2c6   : > { %v4119_v44 = vpop.f32.mrf.mxu1  ;;  %v2663_v61 = vadd.f32 %v4047_v4, %v2371_v11  ;;  %v1791_v26 = vunpack.c.l.bf16 %v5569_v59 }
 0x2c7   : > { %3706 = vst [vmem:[%s5428_s27] sm:$0xff] %v3705_v48   ;;  %v3239_v49 = vadd.f32 %v5392_v2, %v3227_v0  ;;  %v3216_v13 = vadd.f32 %v4118_v28, %v2938_v18  ;;  %v3254_v55 = vmax.f32 %v3246_v1, 0.0 }
 0x2c8   : > { %v4120_v15 = vpop.f32.mrf.mxu1  ;;  %v2941_v25 = vadd.f32 %v4087_v43, %v2663_v61 }
 0x2c9   : > { %v3247_v63 = vadd.f32 %v3239_v49, %v1788_v9  ;;  %v3228_v62 = vmul.f32 %v5387_v21, %v3216_v13  ;;  %v4121_v57 = vadd.f32 %v4120_v15, %v4119_v44  ;;  %v5570_v9 = vld [vmem:[#allocation20_spill] sm:$0xff] }
 0x2ca   : > { %v4122_v45 = vpop.f32.mrf.mxu1  ;;  %v1792_v5 = vunpack.c.l.bf16 %v5570_v9 }
 0x2cb   : > { %v3255_v3 = vmax.f32 %v3247_v63, 0.0  ;;  %v3240_v47 = vadd.f32 %v5392_v2, %v3228_v62  ;;  %v3217_v27 = vadd.f32 %v4121_v57, %v2939_v51 }
 0x2cc   : > { %v4123_v35 = vpop.f32.mrf.mxu1 }
 0x2cd   : > { %v3710_v40 = vpack.c.bf16 %v3255_v3, %v3254_v55  ;;  %v3229_v30 = vmul.f32 %v5387_v21, %v3217_v27  ;;  %v4124_v19 = vadd.f32 %v4123_v35, %v4122_v45  ;;  %v3248_v24 = vadd.f32 %v3240_v47, %v1789_v50 }
 0x2ce   : > { %v4125_v41 = vpop.f32.mrf.mxu1 }
 0x2cf   : > { %3725 = vst [vmem:[%s5428_s27 + $0x8] sm:$0xff] %v3710_v40   ;;  %v3241_v31 = vadd.f32 %v5392_v2, %v3229_v30  ;;  %v3218_v38 = vadd.f32 %v4124_v19, %v2940_v56  ;;  %v3256_v12 = vmax.f32 %v3248_v24, 0.0 }
 0x2d0   : > { %v4126_v42 = vpop.f32.mrf.mxu1 }
 0x2d1   : > { %v3249_v29 = vadd.f32 %v3241_v31, %v1790_v33  ;;  %v3230_v60 = vmul.f32 %v5387_v21, %v3218_v38  ;;  %v4127_v46 = vadd.f32 %v4126_v42, %v4125_v41 }
 0x2d3   : > { %v3257_v14 = vmax.f32 %v3249_v29, 0.0  ;;  %v3242_v39 = vadd.f32 %v5392_v2, %v3230_v60  ;;  %v3219_v16 = vadd.f32 %v4127_v46, %v2941_v25 }
 0x2d5   : > { %v3715_v10 = vpack.c.bf16 %v3257_v14, %v3256_v12  ;;  %v3231_v18 = vmul.f32 %v5387_v21, %v3219_v16  ;;  %v3250_v48 = vadd.f32 %v3242_v39, %v1791_v26 }
 0x2d7   : > { %3726 = vst [vmem:[%s5428_s27 + $0x10] sm:$0xff] %v3715_v10   ;;  %v3243_v0 = vadd.f32 %v5392_v2, %v3231_v18  ;;  %v3258_v7 = vmax.f32 %v3250_v48, 0.0 }
 0x2d9   : > { %v3251_v28 = vadd.f32 %v3243_v0, %v1792_v5 }
 0x2db   : > { %v3259_v58 = vmax.f32 %v3251_v28, 0.0 }
 0x2dd   : > { %v3720_v21 = vpack.c.bf16 %v3259_v58, %v3258_v7 }
 0x2df   : > { %3727 = vst [vmem:[%s5428_s27 + $0x18] sm:$0xff] %v3720_v21  }
 0x2e0   : > { %4512 = shalt.err (!%p4509_p5)
}
 0x2e1   : > { %s4513_s30 = scalar_lea.hbm %s5453_s13, 512  ;;  %s4517_s7 = scalar_lea.hbm %s5502_s4, 1536 }
 0x2e2   : > { %p4514_p10 = scmp.ne.s32.totalorder %s5453_s13, %s4513_s30  ;;  %p4518_p4 = scmp.lt.s32.totalorder %s5453_s13, %s5502_s4 }
 0x2e3   : > { %p4519_p6 = scmp.lt.s32.totalorder %s4517_s7, %s4513_s30 }
 0x2e4   : > { %p4515_p9 = pnand %p4514_p10, %p5571_p2 }
 0x2e5   : > { %p4520_p8 = por %p4519_p6, %p4518_p4 }
 0x2e6   : > { %p4516_p1 = pneg %p4515_p9 }
 0x2e8   : > { %p4521_p3 = pnand %p4520_p8, %p4516_p1 }
 0x2ea   : > { %4524 = shalt.err (!%p4521_p3)
}
 0x2eb   : > { %s4576_s27 = smov 64   ;;  %s4577_s24 = smov 4  }
 0x2ec   : > { %4138 = dma.vmem_to_hbm [thread:$0]  (%p5571_p2), %s5455_s28, 512, %s5453_s13, %s3301_s25, %s4576_s27, %s4576_s27, %s4577_s24  }
 0x2ed PF: > { %p4160_p7 = scmp.ge.s32.totalorder %s4567_s18, 2  ;;  %s3330_s6 = sand.u32 1, %s4555_s15  }
 0x2ee   : > { %p5572_p11 = scmp.ne.s32.totalorder %s5516_s22, 0  ;;  %s3331_s12 = scalar_lea.sflag [#allocation5], %s3330_s6 }
 0x2f0   : > { %p4152_p12 = pnand %p4160_p7, %p5572_p11 }
 0x2f2   : > { %p4153_p13 = pneg %p4152_p12 }
 0x2f4   : > { %4550 = dma.done.wait (%p4153_p13), %s3331_s12, 512  }
 0x2f5   : > { %4552 = vsyncadd (%p4153_p13), %s3331_s12, 4294966784  ;;  %p18_p0 = scmp.ge.s32.totalorder %s4680_s11, 5   ;;  %s5573_s15 = smov %s4559_s16 }
 0x2f6   : > { %s5574_s16 = smov %s4563_s17  ;;  %s5575_s17 = smov %s4696_s20 }
 0x2f7   : > { %s5576_s18 = smov %s4680_s11  ;;  %20 = sbr.rel (!%p18_p0) target bundleno = 6 (0x6), region = 97 }
 0x2fc   :  { %3336 = vsyncpa [#allocation4], 1 }
 0x2fd   :  { %3338 = vsyncpa [#allocation4 + $0x1], 1 }
 0x2fe   :  { %3339 = vsyncpa [#allocation7], 1 }
 0x2ff   :  { %3340 = vsyncpa [#allocation5], 1 }
 0x300   :  { %3342 = vsyncpa [#allocation5 + $0x1], 1 }

</bundles_post_ra>
